<compile_context>
chip_gen: v6e
topology: v6e:2x2x1
jax: 0.10.0
libtpu: 0.0.40
codegen_flags: <defaults>
</compile_context>

<pallas_src>
import jax
import jax.numpy as jnp
from jax.experimental import pallas as pl
from jax.experimental.pallas import tpu as pltpu

# ---------------- problem sizes (small, consistent with the module) ----------------
B = 8                      # batch (num envs), multiple of 8 sublanes
PROP_DIM = 48              # proprioceptive obs used directly by the actor
ENC_IN = 187               # depth map 11 x 17 = 187 (num_encoder_obs)
OBS_DIM = PROP_DIM + ENC_IN            # 235
ENC_HID = [128, 64, 32]    # encoder_hidden_dims
NUM_ACTIONS = 12
ACTOR_IN = PROP_DIM + ENC_HID[-1]      # 80  (num_actor_obs)
ACTOR_HID = [64, 64, 64]               # shrunk from [256,256,256] for a small example
CRITIC_IN = OBS_DIM                    # 235 (num_critic_obs, privileged obs)
CRITIC_HID = [64, 64, 64]
INIT_NOISE_STD = 1.0
LANE = 128                 # lane-dense output width

F32 = jnp.float32
BF16 = jnp.bfloat16


def _elu(x):
    # nn.ELU(alpha=1.0). exp(min(x,0)) avoids exp overflow on the discarded branch.
    # (expm1 would be marginally more precise; exp is guaranteed to lower in Mosaic.)
    return jnp.where(x > 0.0, x, jnp.exp(jnp.minimum(x, 0.0)) - 1.0)


def _relu(x):
    return jnp.maximum(x, 0.0)


def _dot(a, b):
    return jnp.dot(a, b, preferred_element_type=jnp.float32)


# ---------------- fused Pallas kernel ----------------
def fused_actor_critic_kernel(
        obs_ref, cobs_ref,
        ew0, eb0, ew1, eb1, ew2, eb2,
        aw0p, aw0e, ab0, aw1, ab1, aw2, ab2, aw3, ab3,
        cw0, cb0, cw1, cb1, cw2, cb2, cw3, cb3,
        out_ref):
    """program 0: DmEncoder + actor MLP -> out[0] (actions mean, lane-padded)
       program 1: critic MLP           -> out[1] (value, lane-padded)"""
    pid = pl.program_id(0)

    @pl.when(pid == 0)
    def _actor_path():
        obs = obs_ref[...]                                     # bf16 (B, 235)
        # DmEncoder: ew0 rows 0:48 are zero, so obs @ ew0 == obs[:, 48:] @ W_enc0
        h = _relu(_dot(obs, ew0[...]) + eb0[...])
        h = _relu(_dot(h.astype(BF16), ew1[...]) + eb1[...])
        enc = _dot(h.astype(BF16), ew2[...]) + eb2[...]        # (B, 32) f32
        # actor layer 0: concat(obs[:, :48], enc) @ W0 == obs @ aw0p + enc @ aw0e
        # (aw0p rows 48: are zero)
        h = _elu(_dot(obs, aw0p[...]) + _dot(enc.astype(BF16), aw0e[...]) + ab0[...])
        h = _elu(_dot(h.astype(BF16), aw1[...]) + ab1[...])
        h = _elu(_dot(h.astype(BF16), aw2[...]) + ab2[...])
        out = _dot(h.astype(BF16), aw3[...]) + ab3[...]        # (B, 128) lane-dense
        out_ref[0] = out.astype(out_ref.dtype)

    @pl.when(pid == 1)
    def _critic_path():
        x = cobs_ref[...]                                      # bf16 (B, 235)
        h = _elu(_dot(x, cw0[...]) + cb0[...])
        h = _elu(_dot(h.astype(BF16), cw1[...]) + cb1[...])
        h = _elu(_dot(h.astype(BF16), cw2[...]) + cb2[...])
        out = _dot(h.astype(BF16), cw3[...]) + cb3[...]        # (B, 128) lane-dense
        out_ref[0] = out.astype(out_ref.dtype)


# ---------------- wrapper ----------------
def actor_critic_forward(observations, critic_observations, kparams):
    """Returns (actions_mean [B, 12], value [B, 1]) from one fused pallas_call."""
    bsz = observations.shape[0]
    obs = observations.astype(BF16)
    cobs = critic_observations.astype(BF16)
    args = (obs, cobs) + tuple(kparams)

    in_specs = [pl.BlockSpec(a.shape, lambda i, _n=a.ndim: (0,) * _n) for a in args]
    out = pl.pallas_call(
        fused_actor_critic_kernel,
        out_shape=jax.ShapeDtypeStruct((2, bsz, LANE), F32),
        grid=(2,),
        in_specs=in_specs,
        out_specs=pl.BlockSpec((1, bsz, LANE), lambda i: (i, 0, 0)),
        compiler_params=pltpu.CompilerParams(
            dimension_semantics=("parallel",)),   # actor/critic on separate TCs on v7x
    )(*args)

    actions_mean = out[0, :, :NUM_ACTIONS]
    value = out[1, :, :1]
    return actions_mean, value


# ---------------- deterministic parameter construction ----------------
def _linear(key, d_in, d_out):
    kw, kb = jax.random.split(key)
    w = (jax.random.normal(kw, (d_in, d_out), F32) * 0.05).astype(F32)
    b = (jax.random.normal(kb, (1, d_out), F32) * 0.01).astype(F32)
    return w, b


def build_params(key):
    keys = jax.random.split(key, 16)
    k = iter(keys)
    # encoder: 187 -> 128 -> 64 -> 32
    enc = [_linear(next(k), ENC_IN, ENC_HID[0]),
           _linear(next(k), ENC_HID[0], ENC_HID[1]),
           _linear(next(k), ENC_HID[1], ENC_HID[2])]
    # actor: 80 -> 64 -> 64 -> 64 -> 12
    actor_dims = [ACTOR_IN] + ACTOR_HID + [NUM_ACTIONS]
    actor = [_linear(next(k), actor_dims[i], actor_dims[i + 1])
             for i in range(len(actor_dims) - 1)]
    # critic: 235 -> 64 -> 64 -> 64 -> 1
    critic_dims = [CRITIC_IN] + CRITIC_HID + [1]
    critic = [_linear(next(k), critic_dims[i], critic_dims[i + 1])
              for i in range(len(critic_dims) - 1)]
    std = jnp.full((NUM_ACTIONS,), INIT_NOISE_STD, F32)  # self.std parameter
    return enc, actor, critic, std


def prepare_kernel_params(enc, actor, critic):
    """One-time prep (amortized across rollout steps): bf16 weights, f32 biases,
    slice/concat folded into zero-padded first-layer weights, final layers padded
    to a 128-lane-dense output."""
    (ew0, eb0), (ew1, eb1), (ew2, eb2) = enc
    (aw0, ab0), (aw1, ab1), (aw2, ab2), (aw3, ab3) = actor
    (cw0, cb0), (cw1, cb1), (cw2, cb2), (cw3, cb3) = critic

    def w16(w):
        return w.astype(BF16)

    # encoder first layer: accepts the full obs; rows 0:48 (prop) are zero
    ew0_p = jnp.zeros((OBS_DIM, ENC_HID[0]), F32).at[PROP_DIM:].set(ew0).astype(BF16)
    # actor first layer: prop part padded to full obs width (rows 48: zero), enc part as-is
    aw0p = jnp.zeros((OBS_DIM, ACTOR_HID[0]), F32).at[:PROP_DIM].set(aw0[:PROP_DIM]).astype(BF16)
    aw0e = w16(aw0[PROP_DIM:])
    # final layers padded to 128 lanes -> dense stores
    aw3_p = jnp.zeros((ACTOR_HID[-1], LANE), F32).at[:, :NUM_ACTIONS].set(aw3).astype(BF16)
    ab3_p = jnp.zeros((1, LANE), F32).at[:, :NUM_ACTIONS].set(ab3)
    cw3_p = jnp.zeros((CRITIC_HID[-1], LANE), F32).at[:, :1].set(cw3).astype(BF16)
    cb3_p = jnp.zeros((1, LANE), F32).at[:, :1].set(cb3)

    return (ew0_p, eb0, w16(ew1), eb1, w16(ew2), eb2,
            aw0p, aw0e, ab0, w16(aw1), ab1, w16(aw2), ab2, aw3_p, ab3_p,
            w16(cw0), cb0, w16(cw1), cb1, w16(cw2), cb2, cw3_p, cb3_p)


# ---------------- pure-JAX reference (mirrors the bf16 weight/activation casts) ----------------
def _q(x):
    return x.astype(BF16)


def _lin(x, w, b):
    return jnp.dot(_q(x), _q(w), preferred_element_type=F32) + b


def ref_act_inference(obs, enc_params, actor_params):
    obs = _q(obs).astype(F32)
    dm = obs[:, PROP_DIM:]
    h = _relu(_lin(dm, *enc_params[0]))
    h = _relu(_lin(h, *enc_params[1]))
    enc = _lin(h, *enc_params[2])
    x = jnp.concatenate([obs[:, :PROP_DIM], enc], axis=-1)
    for i, (w, b) in enumerate(actor_params):
        x = _lin(x, w, b)
        if i < len(actor_params) - 1:
            x = _elu(x)
    return x


def ref_evaluate(obs, critic_params):
    x = _q(obs).astype(F32)
    for i, (w, b) in enumerate(critic_params):
        x = _lin(x, w, b)
        if i < len(critic_params) - 1:
            x = _elu(x)
    return x


if __name__ == "__main__":
    root = jax.random.PRNGKey(0)
    k_param, k_obs, k_cobs = jax.random.split(root, 3)
    enc_p, actor_p, critic_p, std = build_params(k_param)
    kparams = prepare_kernel_params(enc_p, actor_p, critic_p)   # done once, reused every step

    observations = jax.random.normal(k_obs, (B, OBS_DIM), F32)          # (8, 235)
    critic_observations = jax.random.normal(k_cobs, (B, CRITIC_IN), F32)  # (8, 235)

    actions_mean, value = actor_critic_forward(observations, critic_observations, kparams)
    action_std = jnp.broadcast_to(std, actions_mean.shape)  # Normal(mean, mean*0 + std).stddev
    jax.block_until_ready((actions_mean, value, action_std))

    # correctness vs pure-JAX reference of the PyTorch forward semantics
    ref_mean = ref_act_inference(observations, enc_p, actor_p)
    ref_val = ref_evaluate(critic_observations, critic_p)
    assert actions_mean.shape == (B, NUM_ACTIONS)
    assert value.shape == (B, 1)
    assert jnp.allclose(actions_mean, ref_mean, rtol=1e-3, atol=1e-4), \
        float(jnp.max(jnp.abs(actions_mean - ref_mean)))
    assert jnp.allclose(value, ref_val, rtol=1e-3, atol=1e-4), \
        float(jnp.max(jnp.abs(value - ref_val)))

    print("KERNEL_OK")
</pallas_src>

<mosaic_0001>
module attributes {stable_mosaic.version = 11 : i64} {
  func.func @fused_actor_critic_kernel(%arg0: i32, %arg1: memref<8x235xbf16, #tpu.memory_space<vmem>>, %arg2: memref<8x235xbf16, #tpu.memory_space<vmem>>, %arg3: memref<235x128xbf16, #tpu.memory_space<vmem>>, %arg4: memref<1x128xf32, #tpu.memory_space<vmem>>, %arg5: memref<128x64xbf16, #tpu.memory_space<vmem>>, %arg6: memref<1x64xf32, #tpu.memory_space<vmem>>, %arg7: memref<64x32xbf16, #tpu.memory_space<vmem>>, %arg8: memref<1x32xf32, #tpu.memory_space<vmem>>, %arg9: memref<235x64xbf16, #tpu.memory_space<vmem>>, %arg10: memref<32x64xbf16, #tpu.memory_space<vmem>>, %arg11: memref<1x64xf32, #tpu.memory_space<vmem>>, %arg12: memref<64x64xbf16, #tpu.memory_space<vmem>>, %arg13: memref<1x64xf32, #tpu.memory_space<vmem>>, %arg14: memref<64x64xbf16, #tpu.memory_space<vmem>>, %arg15: memref<1x64xf32, #tpu.memory_space<vmem>>, %arg16: memref<64x128xbf16, #tpu.memory_space<vmem>>, %arg17: memref<1x128xf32, #tpu.memory_space<vmem>>, %arg18: memref<235x64xbf16, #tpu.memory_space<vmem>>, %arg19: memref<1x64xf32, #tpu.memory_space<vmem>>, %arg20: memref<64x64xbf16, #tpu.memory_space<vmem>>, %arg21: memref<1x64xf32, #tpu.memory_space<vmem>>, %arg22: memref<64x64xbf16, #tpu.memory_space<vmem>>, %arg23: memref<1x64xf32, #tpu.memory_space<vmem>>, %arg24: memref<64x128xbf16, #tpu.memory_space<vmem>>, %arg25: memref<1x128xf32, #tpu.memory_space<vmem>>, %arg26: memref<1x8x128xf32, #tpu.memory_space<vmem>>) attributes {dimension_semantics = [#tpu.dimension_semantics<parallel>], iteration_bounds = array<i64: 2>, scalar_prefetch = 0 : i64, scratch_operands = 0 : i64, tpu.core_type = #tpu.core_type<tc>, window_params = [{pipeline_mode = #tpu.pipeline_mode<synchronous>, transform_indices = @transform_0, window_bounds = array<i64: 8, 235>}, {pipeline_mode = #tpu.pipeline_mode<synchronous>, transform_indices = @transform_1, window_bounds = array<i64: 8, 235>}, {pipeline_mode = #tpu.pipeline_mode<synchronous>, transform_indices = @transform_2, window_bounds = array<i64: 235, 128>}, {pipeline_mode = #tpu.pipeline_mode<synchronous>, transform_indices = @transform_3, window_bounds = array<i64: 1, 128>}, {pipeline_mode = #tpu.pipeline_mode<synchronous>, transform_indices = @transform_4, window_bounds = array<i64: 128, 64>}, {pipeline_mode = #tpu.pipeline_mode<synchronous>, transform_indices = @transform_5, window_bounds = array<i64: 1, 64>}, {pipeline_mode = #tpu.pipeline_mode<synchronous>, transform_indices = @transform_6, window_bounds = array<i64: 64, 32>}, {pipeline_mode = #tpu.pipeline_mode<synchronous>, transform_indices = @transform_7, window_bounds = array<i64: 1, 32>}, {pipeline_mode = #tpu.pipeline_mode<synchronous>, transform_indices = @transform_8, window_bounds = array<i64: 235, 64>}, {pipeline_mode = #tpu.pipeline_mode<synchronous>, transform_indices = @transform_9, window_bounds = array<i64: 32, 64>}, {pipeline_mode = #tpu.pipeline_mode<synchronous>, transform_indices = @transform_10, window_bounds = array<i64: 1, 64>}, {pipeline_mode = #tpu.pipeline_mode<synchronous>, transform_indices = @transform_11, window_bounds = array<i64: 64, 64>}, {pipeline_mode = #tpu.pipeline_mode<synchronous>, transform_indices = @transform_12, window_bounds = array<i64: 1, 64>}, {pipeline_mode = #tpu.pipeline_mode<synchronous>, transform_indices = @transform_13, window_bounds = array<i64: 64, 64>}, {pipeline_mode = #tpu.pipeline_mode<synchronous>, transform_indices = @transform_14, window_bounds = array<i64: 1, 64>}, {pipeline_mode = #tpu.pipeline_mode<synchronous>, transform_indices = @transform_15, window_bounds = array<i64: 64, 128>}, {pipeline_mode = #tpu.pipeline_mode<synchronous>, transform_indices = @transform_16, window_bounds = array<i64: 1, 128>}, {pipeline_mode = #tpu.pipeline_mode<synchronous>, transform_indices = @transform_17, window_bounds = array<i64: 235, 64>}, {pipeline_mode = #tpu.pipeline_mode<synchronous>, transform_indices = @transform_18, window_bounds = array<i64: 1, 64>}, {pipeline_mode = #tpu.pipeline_mode<synchronous>, transform_indices = @transform_19, window_bounds = array<i64: 64, 64>}, {pipeline_mode = #tpu.pipeline_mode<synchronous>, transform_indices = @transform_20, window_bounds = array<i64: 1, 64>}, {pipeline_mode = #tpu.pipeline_mode<synchronous>, transform_indices = @transform_21, window_bounds = array<i64: 64, 64>}, {pipeline_mode = #tpu.pipeline_mode<synchronous>, transform_indices = @transform_22, window_bounds = array<i64: 1, 64>}, {pipeline_mode = #tpu.pipeline_mode<synchronous>, transform_indices = @transform_23, window_bounds = array<i64: 64, 128>}, {pipeline_mode = #tpu.pipeline_mode<synchronous>, transform_indices = @transform_24, window_bounds = array<i64: 1, 128>}, {transform_indices = @transform_25, window_bounds = array<i64: 1, 8, 128>}]} {
    %c0_i32 = arith.constant 0 : i32
    %0 = arith.cmpi eq, %arg0, %c0_i32 : i32
    %1 = arith.extui %0 : i1 to i32
    %c0_i32_0 = arith.constant 0 : i32
    %2 = arith.cmpi ne, %1, %c0_i32_0 : i32
    scf.if %2 {
      %c0 = arith.constant 0 : index
      %c0_2 = arith.constant 0 : index
      %6 = vector.load %arg1[%c0, %c0_2] : memref<8x235xbf16, #tpu.memory_space<vmem>>, vector<8x235xbf16>
      %c0_3 = arith.constant 0 : index
      %c0_4 = arith.constant 0 : index
      %7 = vector.load %arg3[%c0_3, %c0_4] : memref<235x128xbf16, #tpu.memory_space<vmem>>, vector<235x128xbf16>
      %cst = arith.constant dense<0.000000e+00> : vector<8x128xf32>
      %8 = tpu.matmul %6, %7, %cst {dimension_numbers = #tpu.dot_dimension_numbers<[1], [0], [0], [1], [0, 0, 1, 1], [], []>} : vector<8x235xbf16>, vector<235x128xbf16>, vector<8x128xf32> -> vector<8x128xf32>
      %c0_5 = arith.constant 0 : index
      %c0_6 = arith.constant 0 : index
      %9 = vector.load %arg4[%c0_5, %c0_6] : memref<1x128xf32, #tpu.memory_space<vmem>>, vector<1x128xf32>
      %10 = vector.broadcast %9 : vector<1x128xf32> to vector<8x128xf32>
      %11 = arith.addf %8, %10 : vector<8x128xf32>
      %cst_7 = arith.constant 0.000000e+00 : f32
      %12 = vector.broadcast %cst_7 : f32 to vector<8x128xf32>
      %13 = arith.maximumf %11, %12 : vector<8x128xf32>
      %14 = arith.truncf %13 : vector<8x128xf32> to vector<8x128xbf16>
      %c0_8 = arith.constant 0 : index
      %c0_9 = arith.constant 0 : index
      %15 = vector.load %arg5[%c0_8, %c0_9] : memref<128x64xbf16, #tpu.memory_space<vmem>>, vector<128x64xbf16>
      %cst_10 = arith.constant dense<0.000000e+00> : vector<8x64xf32>
      %16 = tpu.matmul %14, %15, %cst_10 {dimension_numbers = #tpu.dot_dimension_numbers<[1], [0], [0], [1], [0, 0, 1, 1], [], []>} : vector<8x128xbf16>, vector<128x64xbf16>, vector<8x64xf32> -> vector<8x64xf32>
      %c0_11 = arith.constant 0 : index
      %c0_12 = arith.constant 0 : index
      %17 = vector.load %arg6[%c0_11, %c0_12] : memref<1x64xf32, #tpu.memory_space<vmem>>, vector<1x64xf32>
      %18 = vector.broadcast %17 : vector<1x64xf32> to vector<8x64xf32>
      %19 = arith.addf %16, %18 : vector<8x64xf32>
      %cst_13 = arith.constant 0.000000e+00 : f32
      %20 = vector.broadcast %cst_13 : f32 to vector<8x64xf32>
      %21 = arith.maximumf %19, %20 : vector<8x64xf32>
      %22 = arith.truncf %21 : vector<8x64xf32> to vector<8x64xbf16>
      %c0_14 = arith.constant 0 : index
      %c0_15 = arith.constant 0 : index
      %23 = vector.load %arg7[%c0_14, %c0_15] : memref<64x32xbf16, #tpu.memory_space<vmem>>, vector<64x32xbf16>
      %cst_16 = arith.constant dense<0.000000e+00> : vector<8x32xf32>
      %24 = tpu.matmul %22, %23, %cst_16 {dimension_numbers = #tpu.dot_dimension_numbers<[1], [0], [0], [1], [0, 0, 1, 1], [], []>} : vector<8x64xbf16>, vector<64x32xbf16>, vector<8x32xf32> -> vector<8x32xf32>
      %c0_17 = arith.constant 0 : index
      %c0_18 = arith.constant 0 : index
      %25 = vector.load %arg8[%c0_17, %c0_18] : memref<1x32xf32, #tpu.memory_space<vmem>>, vector<1x32xf32>
      %26 = vector.broadcast %25 : vector<1x32xf32> to vector<8x32xf32>
      %27 = arith.addf %24, %26 : vector<8x32xf32>
      %c0_19 = arith.constant 0 : index
      %c0_20 = arith.constant 0 : index
      %28 = vector.load %arg9[%c0_19, %c0_20] : memref<235x64xbf16, #tpu.memory_space<vmem>>, vector<235x64xbf16>
      %cst_21 = arith.constant dense<0.000000e+00> : vector<8x64xf32>
      %29 = tpu.matmul %6, %28, %cst_21 {dimension_numbers = #tpu.dot_dimension_numbers<[1], [0], [0], [1], [0, 0, 1, 1], [], []>} : vector<8x235xbf16>, vector<235x64xbf16>, vector<8x64xf32> -> vector<8x64xf32>
      %30 = arith.truncf %27 : vector<8x32xf32> to vector<8x32xbf16>
      %c0_22 = arith.constant 0 : index
      %c0_23 = arith.constant 0 : index
      %31 = vector.load %arg10[%c0_22, %c0_23] : memref<32x64xbf16, #tpu.memory_space<vmem>>, vector<32x64xbf16>
      %cst_24 = arith.constant dense<0.000000e+00> : vector<8x64xf32>
      %32 = tpu.matmul %30, %31, %cst_24 {dimension_numbers = #tpu.dot_dimension_numbers<[1], [0], [0], [1], [0, 0, 1, 1], [], []>} : vector<8x32xbf16>, vector<32x64xbf16>, vector<8x64xf32> -> vector<8x64xf32>
      %33 = arith.addf %29, %32 : vector<8x64xf32>
      %c0_25 = arith.constant 0 : index
      %c0_26 = arith.constant 0 : index
      %34 = vector.load %arg11[%c0_25, %c0_26] : memref<1x64xf32, #tpu.memory_space<vmem>>, vector<1x64xf32>
      %35 = vector.broadcast %34 : vector<1x64xf32> to vector<8x64xf32>
      %36 = arith.addf %33, %35 : vector<8x64xf32>
      %cst_27 = arith.constant 0.000000e+00 : f32
      %37 = vector.broadcast %cst_27 : f32 to vector<8x64xf32>
      %38 = arith.cmpf ogt, %36, %37 : vector<8x64xf32>
      %cst_28 = arith.constant 0.000000e+00 : f32
      %39 = vector.broadcast %cst_28 : f32 to vector<8x64xf32>
      %40 = arith.minimumf %36, %39 : vector<8x64xf32>
      %41 = math.exp %40 : vector<8x64xf32>
      %cst_29 = arith.constant 1.000000e+00 : f32
      %42 = vector.broadcast %cst_29 : f32 to vector<8x64xf32>
      %43 = arith.subf %41, %42 : vector<8x64xf32>
      %44 = arith.select %38, %36, %43 : vector<8x64xi1>, vector<8x64xf32>
      %45 = arith.truncf %44 : vector<8x64xf32> to vector<8x64xbf16>
      %c0_30 = arith.constant 0 : index
      %c0_31 = arith.constant 0 : index
      %46 = vector.load %arg12[%c0_30, %c0_31] : memref<64x64xbf16, #tpu.memory_space<vmem>>, vector<64x64xbf16>
      %cst_32 = arith.constant dense<0.000000e+00> : vector<8x64xf32>
      %47 = tpu.matmul %45, %46, %cst_32 {dimension_numbers = #tpu.dot_dimension_numbers<[1], [0], [0], [1], [0, 0, 1, 1], [], []>} : vector<8x64xbf16>, vector<64x64xbf16>, vector<8x64xf32> -> vector<8x64xf32>
      %c0_33 = arith.constant 0 : index
      %c0_34 = arith.constant 0 : index
      %48 = vector.load %arg13[%c0_33, %c0_34] : memref<1x64xf32, #tpu.memory_space<vmem>>, vector<1x64xf32>
      %49 = vector.broadcast %48 : vector<1x64xf32> to vector<8x64xf32>
      %50 = arith.addf %47, %49 : vector<8x64xf32>
      %cst_35 = arith.constant 0.000000e+00 : f32
      %51 = vector.broadcast %cst_35 : f32 to vector<8x64xf32>
      %52 = arith.cmpf ogt, %50, %51 : vector<8x64xf32>
      %cst_36 = arith.constant 0.000000e+00 : f32
      %53 = vector.broadcast %cst_36 : f32 to vector<8x64xf32>
      %54 = arith.minimumf %50, %53 : vector<8x64xf32>
      %55 = math.exp %54 : vector<8x64xf32>
      %cst_37 = arith.constant 1.000000e+00 : f32
      %56 = vector.broadcast %cst_37 : f32 to vector<8x64xf32>
      %57 = arith.subf %55, %56 : vector<8x64xf32>
      %58 = arith.select %52, %50, %57 : vector<8x64xi1>, vector<8x64xf32>
      %59 = arith.truncf %58 : vector<8x64xf32> to vector<8x64xbf16>
      %c0_38 = arith.constant 0 : index
      %c0_39 = arith.constant 0 : index
      %60 = vector.load %arg14[%c0_38, %c0_39] : memref<64x64xbf16, #tpu.memory_space<vmem>>, vector<64x64xbf16>
      %cst_40 = arith.constant dense<0.000000e+00> : vector<8x64xf32>
      %61 = tpu.matmul %59, %60, %cst_40 {dimension_numbers = #tpu.dot_dimension_numbers<[1], [0], [0], [1], [0, 0, 1, 1], [], []>} : vector<8x64xbf16>, vector<64x64xbf16>, vector<8x64xf32> -> vector<8x64xf32>
      %c0_41 = arith.constant 0 : index
      %c0_42 = arith.constant 0 : index
      %62 = vector.load %arg15[%c0_41, %c0_42] : memref<1x64xf32, #tpu.memory_space<vmem>>, vector<1x64xf32>
      %63 = vector.broadcast %62 : vector<1x64xf32> to vector<8x64xf32>
      %64 = arith.addf %61, %63 : vector<8x64xf32>
      %cst_43 = arith.constant 0.000000e+00 : f32
      %65 = vector.broadcast %cst_43 : f32 to vector<8x64xf32>
      %66 = arith.cmpf ogt, %64, %65 : vector<8x64xf32>
      %cst_44 = arith.constant 0.000000e+00 : f32
      %67 = vector.broadcast %cst_44 : f32 to vector<8x64xf32>
      %68 = arith.minimumf %64, %67 : vector<8x64xf32>
      %69 = math.exp %68 : vector<8x64xf32>
      %cst_45 = arith.constant 1.000000e+00 : f32
      %70 = vector.broadcast %cst_45 : f32 to vector<8x64xf32>
      %71 = arith.subf %69, %70 : vector<8x64xf32>
      %72 = arith.select %66, %64, %71 : vector<8x64xi1>, vector<8x64xf32>
      %73 = arith.truncf %72 : vector<8x64xf32> to vector<8x64xbf16>
      %c0_46 = arith.constant 0 : index
      %c0_47 = arith.constant 0 : index
      %74 = vector.load %arg16[%c0_46, %c0_47] : memref<64x128xbf16, #tpu.memory_space<vmem>>, vector<64x128xbf16>
      %cst_48 = arith.constant dense<0.000000e+00> : vector<8x128xf32>
      %75 = tpu.matmul %73, %74, %cst_48 {dimension_numbers = #tpu.dot_dimension_numbers<[1], [0], [0], [1], [0, 0, 1, 1], [], []>} : vector<8x64xbf16>, vector<64x128xbf16>, vector<8x128xf32> -> vector<8x128xf32>
      %c0_49 = arith.constant 0 : index
      %c0_50 = arith.constant 0 : index
      %76 = vector.load %arg17[%c0_49, %c0_50] : memref<1x128xf32, #tpu.memory_space<vmem>>, vector<1x128xf32>
      %77 = vector.broadcast %76 : vector<1x128xf32> to vector<8x128xf32>
      %78 = arith.addf %75, %77 : vector<8x128xf32>
      %c0_51 = arith.constant 0 : index
      %c0_52 = arith.constant 0 : index
      %c0_53 = arith.constant 0 : index
      %79 = vector.load %arg26[%c0_51, %c0_52, %c0_53] : memref<1x8x128xf32, #tpu.memory_space<vmem>>, vector<1x8x128xf32>
      %80 = vector.shape_cast %79 : vector<1x8x128xf32> to vector<8x128xf32>
      %81 = vector.shape_cast %78 : vector<8x128xf32> to vector<1x8x128xf32>
      tpu.vector_store %arg26[%c0_51, %c0_52, %c0_53], %81 {strides = array<i32>} : memref<1x8x128xf32, #tpu.memory_space<vmem>>, vector<1x8x128xf32>,
    } else {
    }
    %c1_i32 = arith.constant 1 : i32
    %3 = arith.cmpi eq, %arg0, %c1_i32 : i32
    %4 = arith.extui %3 : i1 to i32
    %c0_i32_1 = arith.constant 0 : i32
    %5 = arith.cmpi ne, %4, %c0_i32_1 : i32
    scf.if %5 {
      %c0 = arith.constant 0 : index
      %c0_2 = arith.constant 0 : index
      %6 = vector.load %arg2[%c0, %c0_2] : memref<8x235xbf16, #tpu.memory_space<vmem>>, vector<8x235xbf16>
      %c0_3 = arith.constant 0 : index
      %c0_4 = arith.constant 0 : index
      %7 = vector.load %arg18[%c0_3, %c0_4] : memref<235x64xbf16, #tpu.memory_space<vmem>>, vector<235x64xbf16>
      %cst = arith.constant dense<0.000000e+00> : vector<8x64xf32>
      %8 = tpu.matmul %6, %7, %cst {dimension_numbers = #tpu.dot_dimension_numbers<[1], [0], [0], [1], [0, 0, 1, 1], [], []>} : vector<8x235xbf16>, vector<235x64xbf16>, vector<8x64xf32> -> vector<8x64xf32>
      %c0_5 = arith.constant 0 : index
      %c0_6 = arith.constant 0 : index
      %9 = vector.load %arg19[%c0_5, %c0_6] : memref<1x64xf32, #tpu.memory_space<vmem>>, vector<1x64xf32>
      %10 = vector.broadcast %9 : vector<1x64xf32> to vector<8x64xf32>
      %11 = arith.addf %8, %10 : vector<8x64xf32>
      %cst_7 = arith.constant 0.000000e+00 : f32
      %12 = vector.broadcast %cst_7 : f32 to vector<8x64xf32>
      %13 = arith.cmpf ogt, %11, %12 : vector<8x64xf32>
      %cst_8 = arith.constant 0.000000e+00 : f32
      %14 = vector.broadcast %cst_8 : f32 to vector<8x64xf32>
      %15 = arith.minimumf %11, %14 : vector<8x64xf32>
      %16 = math.exp %15 : vector<8x64xf32>
      %cst_9 = arith.constant 1.000000e+00 : f32
      %17 = vector.broadcast %cst_9 : f32 to vector<8x64xf32>
      %18 = arith.subf %16, %17 : vector<8x64xf32>
      %19 = arith.select %13, %11, %18 : vector<8x64xi1>, vector<8x64xf32>
      %20 = arith.truncf %19 : vector<8x64xf32> to vector<8x64xbf16>
      %c0_10 = arith.constant 0 : index
      %c0_11 = arith.constant 0 : index
      %21 = vector.load %arg20[%c0_10, %c0_11] : memref<64x64xbf16, #tpu.memory_space<vmem>>, vector<64x64xbf16>
      %cst_12 = arith.constant dense<0.000000e+00> : vector<8x64xf32>
      %22 = tpu.matmul %20, %21, %cst_12 {dimension_numbers = #tpu.dot_dimension_numbers<[1], [0], [0], [1], [0, 0, 1, 1], [], []>} : vector<8x64xbf16>, vector<64x64xbf16>, vector<8x64xf32> -> vector<8x64xf32>
      %c0_13 = arith.constant 0 : index
      %c0_14 = arith.constant 0 : index
      %23 = vector.load %arg21[%c0_13, %c0_14] : memref<1x64xf32, #tpu.memory_space<vmem>>, vector<1x64xf32>
      %24 = vector.broadcast %23 : vector<1x64xf32> to vector<8x64xf32>
      %25 = arith.addf %22, %24 : vector<8x64xf32>
      %cst_15 = arith.constant 0.000000e+00 : f32
      %26 = vector.broadcast %cst_15 : f32 to vector<8x64xf32>
      %27 = arith.cmpf ogt, %25, %26 : vector<8x64xf32>
      %cst_16 = arith.constant 0.000000e+00 : f32
      %28 = vector.broadcast %cst_16 : f32 to vector<8x64xf32>
      %29 = arith.minimumf %25, %28 : vector<8x64xf32>
      %30 = math.exp %29 : vector<8x64xf32>
      %cst_17 = arith.constant 1.000000e+00 : f32
      %31 = vector.broadcast %cst_17 : f32 to vector<8x64xf32>
      %32 = arith.subf %30, %31 : vector<8x64xf32>
      %33 = arith.select %27, %25, %32 : vector<8x64xi1>, vector<8x64xf32>
      %34 = arith.truncf %33 : vector<8x64xf32> to vector<8x64xbf16>
      %c0_18 = arith.constant 0 : index
      %c0_19 = arith.constant 0 : index
      %35 = vector.load %arg22[%c0_18, %c0_19] : memref<64x64xbf16, #tpu.memory_space<vmem>>, vector<64x64xbf16>
      %cst_20 = arith.constant dense<0.000000e+00> : vector<8x64xf32>
      %36 = tpu.matmul %34, %35, %cst_20 {dimension_numbers = #tpu.dot_dimension_numbers<[1], [0], [0], [1], [0, 0, 1, 1], [], []>} : vector<8x64xbf16>, vector<64x64xbf16>, vector<8x64xf32> -> vector<8x64xf32>
      %c0_21 = arith.constant 0 : index
      %c0_22 = arith.constant 0 : index
      %37 = vector.load %arg23[%c0_21, %c0_22] : memref<1x64xf32, #tpu.memory_space<vmem>>, vector<1x64xf32>
      %38 = vector.broadcast %37 : vector<1x64xf32> to vector<8x64xf32>
      %39 = arith.addf %36, %38 : vector<8x64xf32>
      %cst_23 = arith.constant 0.000000e+00 : f32
      %40 = vector.broadcast %cst_23 : f32 to vector<8x64xf32>
      %41 = arith.cmpf ogt, %39, %40 : vector<8x64xf32>
      %cst_24 = arith.constant 0.000000e+00 : f32
      %42 = vector.broadcast %cst_24 : f32 to vector<8x64xf32>
      %43 = arith.minimumf %39, %42 : vector<8x64xf32>
      %44 = math.exp %43 : vector<8x64xf32>
      %cst_25 = arith.constant 1.000000e+00 : f32
      %45 = vector.broadcast %cst_25 : f32 to vector<8x64xf32>
      %46 = arith.subf %44, %45 : vector<8x64xf32>
      %47 = arith.select %41, %39, %46 : vector<8x64xi1>, vector<8x64xf32>
      %48 = arith.truncf %47 : vector<8x64xf32> to vector<8x64xbf16>
      %c0_26 = arith.constant 0 : index
      %c0_27 = arith.constant 0 : index
      %49 = vector.load %arg24[%c0_26, %c0_27] : memref<64x128xbf16, #tpu.memory_space<vmem>>, vector<64x128xbf16>
      %cst_28 = arith.constant dense<0.000000e+00> : vector<8x128xf32>
      %50 = tpu.matmul %48, %49, %cst_28 {dimension_numbers = #tpu.dot_dimension_numbers<[1], [0], [0], [1], [0, 0, 1, 1], [], []>} : vector<8x64xbf16>, vector<64x128xbf16>, vector<8x128xf32> -> vector<8x128xf32>
      %c0_29 = arith.constant 0 : index
      %c0_30 = arith.constant 0 : index
      %51 = vector.load %arg25[%c0_29, %c0_30] : memref<1x128xf32, #tpu.memory_space<vmem>>, vector<1x128xf32>
      %52 = vector.broadcast %51 : vector<1x128xf32> to vector<8x128xf32>
      %53 = arith.addf %50, %52 : vector<8x128xf32>
      %c0_31 = arith.constant 0 : index
      %c0_32 = arith.constant 0 : index
      %c0_33 = arith.constant 0 : index
      %54 = vector.load %arg26[%c0_31, %c0_32, %c0_33] : memref<1x8x128xf32, #tpu.memory_space<vmem>>, vector<1x8x128xf32>
      %55 = vector.shape_cast %54 : vector<1x8x128xf32> to vector<8x128xf32>
      %56 = vector.shape_cast %53 : vector<8x128xf32> to vector<1x8x128xf32>
      tpu.vector_store %arg26[%c0_31, %c0_32, %c0_33], %56 {strides = array<i32>} : memref<1x8x128xf32, #tpu.memory_space<vmem>>, vector<1x8x128xf32>,
    } else {
    }
    return
  }
  func.func @transform_0(%arg0: i32) -> (i32, i32) {
    %c0_i32 = arith.constant 0 : i32
    %c0_i32_0 = arith.constant 0 : i32
    %c0_i32_1 = arith.constant 0 : i32
    return %c0_i32, %c0_i32_0 : i32, i32
  }
  func.func @transform_1(%arg0: i32) -> (i32, i32) {
    %c0_i32 = arith.constant 0 : i32
    %c0_i32_0 = arith.constant 0 : i32
    %c0_i32_1 = arith.constant 0 : i32
    return %c0_i32, %c0_i32_0 : i32, i32
  }
  func.func @transform_2(%arg0: i32) -> (i32, i32) {
    %c0_i32 = arith.constant 0 : i32
    %c0_i32_0 = arith.constant 0 : i32
    %c0_i32_1 = arith.constant 0 : i32
    return %c0_i32, %c0_i32_0 : i32, i32
  }
  func.func @transform_3(%arg0: i32) -> (i32, i32) {
    %c0_i32 = arith.constant 0 : i32
    %c0_i32_0 = arith.constant 0 : i32
    %c0_i32_1 = arith.constant 0 : i32
    return %c0_i32, %c0_i32_0 : i32, i32
  }
  func.func @transform_4(%arg0: i32) -> (i32, i32) {
    %c0_i32 = arith.constant 0 : i32
    %c0_i32_0 = arith.constant 0 : i32
    %c0_i32_1 = arith.constant 0 : i32
    return %c0_i32, %c0_i32_0 : i32, i32
  }
  func.func @transform_5(%arg0: i32) -> (i32, i32) {
    %c0_i32 = arith.constant 0 : i32
    %c0_i32_0 = arith.constant 0 : i32
    %c0_i32_1 = arith.constant 0 : i32
    return %c0_i32, %c0_i32_0 : i32, i32
  }
  func.func @transform_6(%arg0: i32) -> (i32, i32) {
    %c0_i32 = arith.constant 0 : i32
    %c0_i32_0 = arith.constant 0 : i32
    %c0_i32_1 = arith.constant 0 : i32
    return %c0_i32, %c0_i32_0 : i32, i32
  }
  func.func @transform_7(%arg0: i32) -> (i32, i32) {
    %c0_i32 = arith.constant 0 : i32
    %c0_i32_0 = arith.constant 0 : i32
    %c0_i32_1 = arith.constant 0 : i32
    return %c0_i32, %c0_i32_0 : i32, i32
  }
  func.func @transform_8(%arg0: i32) -> (i32, i32) {
    %c0_i32 = arith.constant 0 : i32
    %c0_i32_0 = arith.constant 0 : i32
    %c0_i32_1 = arith.constant 0 : i32
    return %c0_i32, %c0_i32_0 : i32, i32
  }
  func.func @transform_9(%arg0: i32) -> (i32, i32) {
    %c0_i32 = arith.constant 0 : i32
    %c0_i32_0 = arith.constant 0 : i32
    %c0_i32_1 = arith.constant 0 : i32
    return %c0_i32, %c0_i32_0 : i32, i32
  }
  func.func @transform_10(%arg0: i32) -> (i32, i32) {
    %c0_i32 = arith.constant 0 : i32
    %c0_i32_0 = arith.constant 0 : i32
    %c0_i32_1 = arith.constant 0 : i32
    return %c0_i32, %c0_i32_0 : i32, i32
  }
  func.func @transform_11(%arg0: i32) -> (i32, i32) {
    %c0_i32 = arith.constant 0 : i32
    %c0_i32_0 = arith.constant 0 : i32
    %c0_i32_1 = arith.constant 0 : i32
    return %c0_i32, %c0_i32_0 : i32, i32
  }
  func.func @transform_12(%arg0: i32) -> (i32, i32) {
    %c0_i32 = arith.constant 0 : i32
    %c0_i32_0 = arith.constant 0 : i32
    %c0_i32_1 = arith.constant 0 : i32
    return %c0_i32, %c0_i32_0 : i32, i32
  }
  func.func @transform_13(%arg0: i32) -> (i32, i32) {
    %c0_i32 = arith.constant 0 : i32
    %c0_i32_0 = arith.constant 0 : i32
    %c0_i32_1 = arith.constant 0 : i32
    return %c0_i32, %c0_i32_0 : i32, i32
  }
  func.func @transform_14(%arg0: i32) -> (i32, i32) {
    %c0_i32 = arith.constant 0 : i32
    %c0_i32_0 = arith.constant 0 : i32
    %c0_i32_1 = arith.constant 0 : i32
    return %c0_i32, %c0_i32_0 : i32, i32
  }
  func.func @transform_15(%arg0: i32) -> (i32, i32) {
    %c0_i32 = arith.constant 0 : i32
    %c0_i32_0 = arith.constant 0 : i32
    %c0_i32_1 = arith.constant 0 : i32
    return %c0_i32, %c0_i32_0 : i32, i32
  }
  func.func @transform_16(%arg0: i32) -> (i32, i32) {
    %c0_i32 = arith.constant 0 : i32
    %c0_i32_0 = arith.constant 0 : i32
    %c0_i32_1 = arith.constant 0 : i32
    return %c0_i32, %c0_i32_0 : i32, i32
  }
  func.func @transform_17(%arg0: i32) -> (i32, i32) {
    %c0_i32 = arith.constant 0 : i32
    %c0_i32_0 = arith.constant 0 : i32
    %c0_i32_1 = arith.constant 0 : i32
    return %c0_i32, %c0_i32_0 : i32, i32
  }
  func.func @transform_18(%arg0: i32) -> (i32, i32) {
    %c0_i32 = arith.constant 0 : i32
    %c0_i32_0 = arith.constant 0 : i32
    %c0_i32_1 = arith.constant 0 : i32
    return %c0_i32, %c0_i32_0 : i32, i32
  }
  func.func @transform_19(%arg0: i32) -> (i32, i32) {
    %c0_i32 = arith.constant 0 : i32
    %c0_i32_0 = arith.constant 0 : i32
    %c0_i32_1 = arith.constant 0 : i32
    return %c0_i32, %c0_i32_0 : i32, i32
  }
  func.func @transform_20(%arg0: i32) -> (i32, i32) {
    %c0_i32 = arith.constant 0 : i32
    %c0_i32_0 = arith.constant 0 : i32
    %c0_i32_1 = arith.constant 0 : i32
    return %c0_i32, %c0_i32_0 : i32, i32
  }
  func.func @transform_21(%arg0: i32) -> (i32, i32) {
    %c0_i32 = arith.constant 0 : i32
    %c0_i32_0 = arith.constant 0 : i32
    %c0_i32_1 = arith.constant 0 : i32
    return %c0_i32, %c0_i32_0 : i32, i32
  }
  func.func @transform_22(%arg0: i32) -> (i32, i32) {
    %c0_i32 = arith.constant 0 : i32
    %c0_i32_0 = arith.constant 0 : i32
    %c0_i32_1 = arith.constant 0 : i32
    return %c0_i32, %c0_i32_0 : i32, i32
  }
  func.func @transform_23(%arg0: i32) -> (i32, i32) {
    %c0_i32 = arith.constant 0 : i32
    %c0_i32_0 = arith.constant 0 : i32
    %c0_i32_1 = arith.constant 0 : i32
    return %c0_i32, %c0_i32_0 : i32, i32
  }
  func.func @transform_24(%arg0: i32) -> (i32, i32) {
    %c0_i32 = arith.constant 0 : i32
    %c0_i32_0 = arith.constant 0 : i32
    %c0_i32_1 = arith.constant 0 : i32
    return %c0_i32, %c0_i32_0 : i32, i32
  }
  func.func @transform_25(%arg0: i32) -> (i32, i32, i32) {
    %c0_i32 = arith.constant 0 : i32
    %c0_i32_0 = arith.constant 0 : i32
    %c0_i32_1 = arith.constant 0 : i32
    return %arg0, %c0_i32, %c0_i32_0 : i32, i32, i32
  }
}

</mosaic_0001>

<bundles_post_ra>
// kernel: tpu_custom_call.1
= control target key start
LH: loop header
LB: loop body
LE: loop exit
PB: predicated region body
PF: predicated region fallthrough
CT: control target
= control target key end

     0   :  { %s3266_s0 = inlined_call_operand.vmem [shape: bf16[8,235], index: 0, kind: input, shape index: {}]   ;;  %s3267_s1 = inlined_call_operand.vmem [shape: bf16[8,235], index: 1, kind: input, shape index: {}]   ;;  %s3268_s2 = inlined_call_operand.vmem [shape: bf16[235,128], index: 2, kind: input, shape index: {}]   ;;  %s3269_s3 = inlined_call_operand.vmem [shape: f32[1,128], index: 3, kind: input, shape index: {}]   ;;  %s3270_s4 = inlined_call_operand.vmem [shape: bf16[128,64], index: 4, kind: input, shape index: {}]   ;;  %s3271_s5 = inlined_call_operand.vmem [shape: f32[1,64], index: 5, kind: input, shape index: {}]   ;;  %s3272_s6 = inlined_call_operand.vmem [shape: bf16[64,32], index: 6, kind: input, shape index: {}]   ;;  %s3273_s7 = inlined_call_operand.vmem [shape: f32[1,32], index: 7, kind: input, shape index: {}]   ;;  %s3274_s8 = inlined_call_operand.vmem [shape: bf16[235,64], index: 8, kind: input, shape index: {}]   ;;  %s3275_s9 = inlined_call_operand.vmem [shape: bf16[32,64], index: 9, kind: input, shape index: {}]   ;;  %s3276_s10 = inlined_call_operand.vmem [shape: f32[1,64], index: 10, kind: input, shape index: {}]   ;;  %s3277_s11 = inlined_call_operand.vmem [shape: bf16[64,64], index: 11, kind: input, shape index: {}]   ;;  %s3278_s12 = inlined_call_operand.vmem [shape: f32[1,64], index: 12, kind: input, shape index: {}]   ;;  %s3279_s13 = inlined_call_operand.vmem [shape: bf16[64,64], index: 13, kind: input, shape index: {}]   ;;  %s3280_s14 = inlined_call_operand.vmem [shape: f32[1,64], index: 14, kind: input, shape index: {}]   ;;  %s3281_s15 = inlined_call_operand.vmem [shape: bf16[64,128], index: 15, kind: input, shape index: {}]   ;;  %s3282_s16 = inlined_call_operand.vmem [shape: f32[1,128], index: 16, kind: input, shape index: {}]   ;;  %s3283_s17 = inlined_call_operand.vmem [shape: bf16[235,64], index: 17, kind: input, shape index: {}]   ;;  %s3284_s18 = inlined_call_operand.vmem [shape: f32[1,64], index: 18, kind: input, shape index: {}]   ;;  %s3285_s19 = inlined_call_operand.vmem [shape: bf16[64,64], index: 19, kind: input, shape index: {}]   ;;  %s3286_s20 = inlined_call_operand.vmem [shape: f32[1,64], index: 20, kind: input, shape index: {}]   ;;  %s3287_s21 = inlined_call_operand.vmem [shape: bf16[64,64], index: 21, kind: input, shape index: {}]   ;;  %s3288_s22 = inlined_call_operand.vmem [shape: f32[1,64], index: 22, kind: input, shape index: {}]   ;;  %s3289_s23 = inlined_call_operand.vmem [shape: bf16[64,128], index: 23, kind: input, shape index: {}]   ;;  %s3290_s24 = inlined_call_operand.vmem [shape: f32[1,128], index: 24, kind: input, shape index: {}]   ;;  %s3291_s25 = inlined_call_operand.hbm [shape: f32[2,8,128], index: 25, kind: output, shape index: {}]  }
   0x1   :  { %3308 = sst [smem:[#allocation11_spill]] %s3266_s0 }
   0x2   :  { %3309 = sst [smem:[#allocation12_spill]] %s3267_s1 }
   0x3   :  { %3310 = sst [smem:[#allocation13_spill]] %s3268_s2 }
   0x4   :  { %3311 = sst [smem:[#allocation14_spill]] %s3269_s3 }
   0x5   :  { %3312 = sst [smem:[#allocation15_spill]] %s3270_s4 }
   0x6   :  { %3313 = sst [smem:[#allocation16_spill]] %s3271_s5 }
   0x7   :  { %3314 = sst [smem:[#allocation17_spill]] %s3272_s6 }
   0x8   :  { %3315 = sst [smem:[#allocation18_spill]] %s3273_s7 }
   0x9   :  { %3316 = sst [smem:[#allocation19_spill]] %s3274_s8 }
   0xa   :  { %3317 = sst [smem:[#allocation20_spill]] %s3275_s9 }
   0xb   :  { %3318 = sst [smem:[#allocation21_spill]] %s3276_s10 }
   0xc   :  { %30 = vsyncpa [#allocation3], 0 }
   0xd   :  { %32 = vsyncpa [#allocation3 + $0x1], 0  ;;  %s2778_s29 = smov 0   ;;  %s2780_s2 = smov 0  }
   0xe   :  { %s2782_s6 = smov 0   ;;  %s2784_s30 = smov 0  }
   0xf LB: > { %3319 = sst [smem:[#allocation5_spill]] %s2625_s29  ;;  %s2799_s7 = sadd.s32 4294967295, %s2637_s30   ;;  %s2637_s30 = sphi %s2784_s30, %s3343_s30   ;;  %s2633_s6 = sphi %s2782_s6, %s3345_s6   ;;  %s2629_s2 = sphi %s2780_s2, %s3347_s2   ;;  %s2625_s29 = sphi %s2778_s29, %s3346_s29  }
  0x10   : > { %3320 = sst [smem:[#allocation6_spill]] %s2633_s6  ;;  %s2147_s3 = sadd.s32 4294967294, %s2637_s30  }
  0x11   : > { %3321 = sst [smem:[#allocation7_spill]] %s2637_s30  ;;  %s2803_s26 = sadd.s32 1, %s2637_s30  }
  0x12   : > { %3322 = sst [smem:[#allocation8_spill]] %s2803_s26  ;;  %s570_s1 = sadd.s32 1, %s2633_s6 }
  0x13   : > { %s567_s8 = ssub.s32 %s2637_s30, %s2803_s26  ;;  %p580_p0 = scmp.ne.s32.totalorder %s2633_s6, %s2629_s2 }
  0x14   : > { %p568_p1 = scmp.eq.s32.totalorder %s567_s8, 0  ;;  %p581_p2 = scmp.eq.s32.totalorder %s2799_s7, 1 }
  0x15   : > { %p586_p3 = scmp.ne.s32.totalorder %s2629_s2, %s2625_s29  ;;  %p587_p4 = scmp.eq.s32.totalorder %s2147_s3, 1 }
  0x16   : > { %s2814_s27 = scalar_select %p568_p1, %s2633_s6, %s570_s1  }
  0x17   : > { %p2816_p5 = por %p581_p2, %p580_p0  ;;  %p2820_p6 = por %p587_p4, %p586_p3 }
  0x18   : > { %3323 = sst [smem:[#allocation9_spill]] %s2814_s27  ;;  %p2149_p7 = scmp.ge.s32.totalorder %s2637_s30, 1 }
  0x19   : > { %s3325_s28 = scalar_select %p2820_p6, 1, 0 }
  0x1a   : > { %p680_p8 = scmp.lt.s32.totalorder %s2637_s30, 3 }
  0x1b   : > { %3326 = sst [smem:[#allocation10_spill]] %s3325_s28 }
  0x1c   : > { %p681_p9 = pnand %p2149_p7, %p680_p8 }
  0x1d   : > { %s3298_s9 = sand.u32 (!%p681_p9), 1, %s2629_s2   ;;  %p2151_p10 = scmp.ne.s32.totalorder (!%p681_p9), %s2799_s7, 0 }
  0x1e   : > { %684 = sbr.rel (%p681_p9) target bundleno = 2556 (0x9fc), region = 120  ;;  %s2150_s5 = sshll.u32 (!%p681_p9), %s3298_s9, 3 }
  0x1f   : > { %s2829_s0 = scalar_lea.vmem (!%p681_p9), [#allocation2], %s2150_s5 }
  0x23   : > { %747 = sbr.rel (%p2151_p10) target bundleno = 1611 (0x64b), region = 124  ;;  %s3327_s8 = sld [smem:[#allocation13_spill]] (!%p2151_p10) }
  0x24   : > { %s3328_s26 = sld [smem:[#allocation11_spill]] (!%p2151_p10) }
  0x25   : > { %s3329_s1 = sld [smem:[#allocation15_spill]] (!%p2151_p10) }
  0x26   : > { %s3330_s5 = sld [smem:[#allocation14_spill]] (!%p2151_p10) }
  0x27   : > { %s3331_s6 = sld [smem:[#allocation17_spill]] (!%p2151_p10) }
  0x28   : > { %v2639_v1 = vmov 0   ;;  %v2640_v4 = vmov 0.0   ;;  %vm885_vm0 = vcmask 1044480   ;;  %vm881_vm1 = vcmask 875520   ;;  %s3333_s27 = sld [smem:[#allocation16_spill]] }
  0x29   : > { %v2478_v0 = vld [vmem:[%s3327_s8 + $0x38] sm:$0xff]   ;;  %892 = vmatprep.subr.bf16.mxu0 %v2639_v1  ;;  %v2479_v2 = vld [vmem:[%s3327_s8 + $0x30] sm:$0xff]   ;;  %v2480_v3 = vld [vmem:[%s3327_s8 + $0x28] sm:$0xff]   ;;  %2319 = vmatprep.subr.bf16.mxu1 %v2640_v4  ;;  %vm886_vm2 = vcmask 1045504   ;;  %v2641_v11 = vmov 65535   ;;  %vm2642_vm3 = vmmov 0  }
  0x2a   : > { %893 = vmatpush1.bf16.msra.mxu0 %v2478_v0  ;;  %v2481_v5 = vld [vmem:[%s3327_s8 + $0x20] sm:$0xff]   ;;  %v2482_v6 = vld [vmem:[%s3327_s8 + $0x18] sm:$0xff]   ;;  %v2483_v10 = vld [vmem:[%s3327_s8 + $0x10] sm:$0xff]   ;;  %v887_v12 = vsel %vm885_vm0, 4294967295, %v2641_v11  ;;  %2335 = vmatprep.mubr.msk.bf16.mxu1 %vm2642_vm3, %v2640_v4  ;;  %vm1086_vm4 = vcmask 523264   ;;  %s3334_s9 = sld [smem:[#allocation20_spill]] }
  0x2b   : > { %894 = vmatprep.subr.bf16.mxu0 %v2639_v1  ;;  %v748_v7 = vld [vmem:[%s3328_s26] sm:$0xff]  ;;  %v2496_v9 = vld [vmem:[%s3329_s1 + $0x38] sm:$0xff]   ;;  %v2497_v13 = vld [vmem:[%s3329_s1 + $0x30] sm:$0xff]   ;;  %v2874_v15 = vsel %vm886_vm2, %v887_v12, 0  ;;  %vm1177_vm5 = vcmask 261120   ;;  %s3337_s10 = sld [smem:[#allocation21_spill]] }
  0x2c   : > { %v2856_v8 = vcombine.high %v748_v7, %v748_v7  ;;  %2320 = vmatpush3.bf16.msra.mxu1 %v2496_v9  ;;  %v2484_v14 = vld [vmem:[%s3327_s8 + $0x8] sm:$0xff]   ;;  %v2485_v17 = vld [vmem:[%s3327_s8] sm:$0xff]   ;;  %v2486_v18 = vld [vmem:[%s3327_s8 + $0x70] sm:$0x3f]   ;;  %v2927_v29 = vcombine.low %v748_v7, %v748_v7 }
  0x2d   : > { %2321 = vmatprep.subr.bf16.mxu1 %v2640_v4  ;;  %v2498_v16 = vld [vmem:[%s3329_s1 + $0x28] sm:$0xff]   ;;  %v2499_v19 = vld [vmem:[%s3329_s1 + $0x20] sm:$0xff]   ;;  %v890_v20 = vand.u32 %v2486_v18, %v2874_v15  ;;  %v2500_v21 = vld [vmem:[%s3329_s1 + $0x18] sm:$0xff]   ;;  %s3332_s28 = smov %s3331_s6 }
  0x2e   : > { %895 = vmatpush1.bf16.msra.mxu0 %v2479_v2  ;;  %2170 = vmatprep.mubr.msk.bf16.mxu0 %vm881_vm1, %v2856_v8  ;;  %v2488_v22 = vld [vmem:[%s3327_s8 + $0x68] sm:$0xff]   ;;  %v2501_v23 = vld [vmem:[%s3329_s1 + $0x10] sm:$0xff]   ;;  %v2489_v24 = vld [vmem:[%s3327_s8 + $0x60] sm:$0xff]  }
  0x2f   : > { %896 = vmatprep.subr.bf16.mxu0 %v2639_v1  ;;  %v2490_v25 = vld [vmem:[%s3327_s8 + $0x58] sm:$0xff]   ;;  %v2491_v26 = vld [vmem:[%s3327_s8 + $0x50] sm:$0xff]   ;;  %v2492_v27 = vld [vmem:[%s3327_s8 + $0x48] sm:$0xff]  }
  0x30   : > { %2322 = vmatpush3.bf16.msra.mxu1 %v2497_v13  ;;  %v2493_v28 = vld [vmem:[%s3327_s8 + $0x40] sm:$0xff]   ;;  %v2502_v30 = vld [vmem:[%s3329_s1 + $0x8] sm:$0xff]   ;;  %v2504_v38 = vld [vmem:[%s3331_s6 + $0x18] sm:$0xff]  }
  0x31   : > { %2323 = vmatprep.subr.bf16.mxu1 %v2640_v4  ;;  %v2503_v31 = vld [vmem:[%s3329_s1] sm:$0xff]   ;;  %v2505_v41 = vld [vmem:[%s3332_s28 + $0x10] sm:$0xff]   ;;  %v2506_v42 = vld [vmem:[%s3332_s28 + $0x8] sm:$0xff]   ;;  %s3336_s1 = sld [smem:[#allocation19_spill]] }
  0x32   : > { %897 = vmatpush1.bf16.msra.mxu0 %v2480_v3  ;;  %v2152_v32 = vld [vmem:[%s3330_s5] ss:$0 sm:$0xff]  ;;  %v2508_v50 = vld [vmem:[%s3334_s9 + $0x8] sm:$0xff]  }
  0x33   : > { %898 = vmatprep.subr.bf16.mxu0 %v2639_v1  ;;  %v2507_v43 = vld [vmem:[%s3332_s28] sm:$0xff]  }
  0x34   : > { %2324 = vmatpush3.bf16.msra.mxu1 %v2498_v16  ;;  %v2171_v44 = vld [vmem:[%s3333_s27] ss:$0 sm:$0xff]  ;;  %s3335_s27 = sld [smem:[#allocation18_spill]]  ;;  %v2525_v16 = vld [vmem:[%s3277_s11 + $0x10] sm:$0xff]  }
  0x35   : > { %2325 = vmatprep.subr.bf16.mxu1 %v2640_v4  ;;  %v2509_v53 = vld [vmem:[%s3334_s9] sm:$0xff]  }
  0x36   : > { %899 = vmatpush1.bf16.msra.mxu0 %v2481_v5 }
  0x37   : > { %900 = vmatprep.subr.bf16.mxu0 %v2639_v1  ;;  %v2510_v58 = vld [vmem:[%s3336_s1 + $0x38] sm:$0xff]   ;;  %v2511_v62 = vld [vmem:[%s3336_s1 + $0x30] sm:$0xff]   ;;  %v2512_v63 = vld [vmem:[%s3336_s1 + $0x28] sm:$0xff]  }
  0x38   : > { %2326 = vmatpush3.bf16.msra.mxu1 %v2499_v19  ;;  %v2513_v0 = vld [vmem:[%s3336_s1 + $0x20] sm:$0xff]   ;;  %v2514_v2 = vld [vmem:[%s3336_s1 + $0x18] sm:$0xff]   ;;  %v2515_v3 = vld [vmem:[%s3336_s1 + $0x10] sm:$0xff]  }
  0x39   : > { %2327 = vmatprep.subr.bf16.mxu1 %v2640_v4  ;;  %v2516_v5 = vld [vmem:[%s3336_s1 + $0x8] sm:$0xff]   ;;  %v2517_v7 = vld [vmem:[%s3336_s1] sm:$0xff]   ;;  %v2520_v11 = vld [vmem:[%s3336_s1 + $0x58] sm:$0xff]  }
  0x3a   : > { %901 = vmatpush1.bf16.msra.mxu0 %v2482_v6  ;;  %v2180_v54 = vld [vmem:[%s3335_s27] ss:$0 sm:$0xff]  ;;  %v2487_v6 = vld [vmem:[%s3336_s1 + $0x70] sm:$0x3f]   ;;  %v2518_v9 = vld [vmem:[%s3336_s1 + $0x68] sm:$0xff]  }
  0x3b   : > { %902 = vmatprep.subr.bf16.mxu0 %v2639_v1  ;;  %v2521_v12 = vld [vmem:[%s3336_s1 + $0x50] sm:$0xff]   ;;  %v2522_v13 = vld [vmem:[%s3336_s1 + $0x48] sm:$0xff]  }
  0x3c   : > { %2328 = vmatpush3.bf16.msra.mxu1 %v2500_v21 }
  0x3d   : > { %2329 = vmatprep.subr.bf16.mxu1 %v2640_v4 }
  0x3e   : > { %903 = vmatpush1.bf16.msra.mxu0 %v2483_v10  ;;  %v2519_v10 = vld [vmem:[%s3336_s1 + $0x60] sm:$0xff]  }
  0x3f   : > { %904 = vmatprep.subr.bf16.mxu0 %v2639_v1 }
  0x40   : > { %2330 = vmatpush3.bf16.msra.mxu1 %v2501_v23  ;;  %v2205_v23 = vld [vmem:[%s3337_s10] ss:$0 sm:$0xff] }
  0x41   : > { %2331 = vmatprep.subr.bf16.mxu1 %v2640_v4 }
  0x42   : > { %905 = vmatpush1.bf16.msra.mxu0 %v2484_v14  ;;  %v2523_v14 = vld [vmem:[%s3336_s1 + $0x40] sm:$0xff]  }
  0x43   : > { %906 = vmatprep.subr.bf16.mxu0 %v2639_v1 }
  0x44   : > { %2332 = vmatpush3.bf16.msra.mxu1 %v2502_v30 }
  0x45   : > { %2333 = vmatprep.subr.bf16.mxu1 %v2640_v4 }
  0x46   : > { %907 = vmatpush1.bf16.msra.mxu0 %v2485_v17  ;;  %v2527_v17 = vld [vmem:[%s3277_s11] sm:$0xff]  }
  0x47   : > { %910 = vmatprep.subr.bf16.mxu0 %v2639_v1 }
  0x48   : > { %2334 = vmatpush3.bf16.msra.mxu1 %v2503_v31 }
  0x49   : > { %2339 = vmatprep.subr.bf16.mxu1 %v2640_v4 }
  0x4a   : > { %911 = vmatpush2.bf16.msra.mxu0 %v890_v20 }
  0x4b   : > { %912 = vmatprep.subr.bf16.mxu0 %v2639_v1 }
  0x4e   : > { %913 = vmatpush2.bf16.msra.mxu0 %v2488_v22 }
  0x4f   : > { %914 = vmatprep.subr.bf16.mxu0 %v2639_v1 }
  0x52   : > { %915 = vmatpush2.bf16.msra.mxu0 %v2489_v24 }
  0x53   : > { %916 = vmatprep.subr.bf16.mxu0 %v2639_v1 }
  0x56   : > { %917 = vmatpush2.bf16.msra.mxu0 %v2490_v25 }
  0x57   : > { %918 = vmatprep.subr.bf16.mxu0 %v2639_v1 }
  0x5a   : > { %919 = vmatpush2.bf16.msra.mxu0 %v2491_v26 }
  0x5b   : > { %920 = vmatprep.subr.bf16.mxu0 %v2639_v1 }
  0x5e   : > { %921 = vmatpush2.bf16.msra.mxu0 %v2492_v27 }
  0x5f   : > { %922 = vmatprep.subr.bf16.mxu0 %v2639_v1 }
  0x62   : > { %923 = vmatpush2.bf16.msra.mxu0 %v2493_v28 }
  0x63   : > { %2359 = vmatprep.subr.bf16.mxu0 %v2640_v4 }
  0x65   : > { %925 = vmatmul.mubr.bf16.vlgmr.msra.gmra.mxu0 %v2927_v29 }
  0x66   : > { %2367 = vmatprep.mubr.msk.bf16.mxu0 %vm2642_vm3, %v2640_v4 }
 0x125   : > { %v926_v33 = vpop.f32.mrf.mxu0 }
 0x126   : > { %v927_v34 = vadd.f32 %v2152_v32, %v926_v33 }
 0x127   : > { %v928_v35 = vpop.f32.mrf.mxu0 }
 0x128   : > { %v932_v36 = vmax.f32 %v927_v34, 0.0  ;;  %v2528_v35 = vld [vmem:[%s3279_s13 + $0x18] sm:$0xff]  }
 0x129   : > { %v929_v37 = vpop.f32.mrf.mxu0 }
 0x12a   : > { %v933_v39 = vpack.c.bf16 %v932_v36, %v932_v36  ;;  %v2529_v36 = vld [vmem:[%s3279_s13 + $0x10] sm:$0xff]   ;;  %v2530_v37 = vld [vmem:[%s3279_s13 + $0x8] sm:$0xff]  }
 0x12b   : > { %v930_v40 = vpop.f32.mrf.mxu0 }
 0x12c   : > { %2336 = vmatmul.mubr.bf16.vlgmr.msra.gmra.mxu1 %v933_v39  ;;  %v2207_v39 = vld [vmem:[%s3278_s12] ss:$0 sm:$0xff] }
 0x12d   : > { %2340 = vmatpush3.bf16.msra.mxu1 %v2504_v38  ;;  %2347 = vmatprep.mubr.msk.bf16.mxu1 %vm2642_vm3, %v2640_v4  ;;  %v2531_v38 = vld [vmem:[%s3279_s13] sm:$0xff]  }
 0x12e   : > { %2341 = vmatprep.subr.bf16.mxu1 %v2640_v4 }
 0x131   : > { %2342 = vmatpush3.bf16.msra.mxu1 %v2505_v41 }
 0x132   : > { %2343 = vmatprep.subr.bf16.mxu1 %v2640_v4 }
 0x135   : > { %2344 = vmatpush3.bf16.msra.mxu1 %v2506_v42 }
 0x136   : > { %2345 = vmatprep.subr.bf16.mxu1 %v2640_v4 }
 0x139   : > { %2346 = vmatpush3.bf16.msra.mxu1 %v2507_v43 }
 0x13a   : > { %2351 = vmatprep.subr.bf16.mxu1 %v2640_v4 }
 0x1ec   : > { %v1039_v45 = vpop.f32.mrf.mxu1 }
 0x1ed   : > { %v1040_v46 = vadd.f32 %v2171_v44, %v1039_v45 }
 0x1ee   : > { %v2337_v47 = vpop.f32.mrf.mxu1 }
 0x1ef   : > { %v1045_v48 = vmax.f32 %v1040_v46, 0.0 }
 0x1f0   : > { %v1042_v49 = vpop.f32.mrf.mxu1 }
 0x1f1   : > { %v1046_v51 = vpack.c.bf16 %v1045_v48, %v1045_v48 }
 0x1f2   : > { %v2338_v52 = vpop.f32.mrf.mxu1 }
 0x1f3   : > { %2348 = vmatmul.mubr.msk.bf16.vlgmr.msra.gmra.mxu1 %vm1086_vm4, %v1046_v51  ;;  %v2532_v51 = vld [vmem:[%s3281_s15 + $0x18] sm:$0xff]   ;;  %v2533_v52 = vld [vmem:[%s3281_s15 + $0x10] sm:$0xff]  }
 0x1f4   : > { %2352 = vmatpush3.bf16.msra.mxu1 %v2508_v50  ;;  %2355 = vmatprep.mubr.msk.bf16.mxu1 %vm2642_vm3, %v2640_v4 }
 0x1f5   : > { %2353 = vmatprep.subr.bf16.mxu1 %v2640_v4 }
 0x1f8   : > { %2354 = vmatpush3.bf16.msra.mxu1 %v2509_v53  ;;  %v2534_v53 = vld [vmem:[%s3281_s15 + $0x8] sm:$0xff]  }
 0x1f9   : > { %1313 = vmatprep.subr.bf16.mxu1 %v2639_v1 }
 0x2b3   : > { %v1124_v55 = vpop.f32.mrf.mxu1 }
 0x2b4   : > { %v1125_v56 = vadd.f32 %v2180_v54, %v1124_v55  ;;  %v2535_v54 = vld [vmem:[%s3281_s15] sm:$0xff]  }
 0x2b5   : > { %v2349_v57 = vpop.f32.mrf.mxu1  ;;  %v2214_v55 = vld [vmem:[%s3280_s14] ss:$0 sm:$0xff] }
 0x2b6   : > { %v1160_v59 = vpack.c.bf16 %v1125_v56, %v1125_v56 }
 0x2b7   : > { %v1127_v60 = vpop.f32.mrf.mxu1 }
 0x2b8   : > { %2356 = vmatmul.mubr.msk.bf16.vlgmr.msra.gmra.mxu1 %vm1177_vm5, %v1160_v59 }
 0x2b9   : > { %1314 = vmatpush1.bf16.msra.mxu1 %v2510_v58  ;;  %v2350_v61 = vpop.f32.mrf.mxu1  ;;  %2204 = vmatprep.mubr.msk.bf16.mxu1 %vm881_vm1, %v2856_v8  ;;  %v1311_v8 = vand.u32 %v2487_v6, %v2874_v15  ;;  %v2524_v15 = vld [vmem:[%s3277_s11 + $0x18] sm:$0xff]  }
 0x2ba   : > { %1315 = vmatprep.subr.bf16.mxu1 %v2639_v1  ;;  %2360 = vmatpush3.bf16.msra.mxu0 %v2524_v15 }
 0x2bb   : > { %2361 = vmatprep.subr.bf16.mxu0 %v2640_v4 }
 0x2bd   : > { %1316 = vmatpush1.bf16.msra.mxu1 %v2511_v62 }
 0x2be   : > { %1317 = vmatprep.subr.bf16.mxu1 %v2639_v1  ;;  %2362 = vmatpush3.bf16.msra.mxu0 %v2525_v16 }
 0x2bf   : > { %2363 = vmatprep.subr.bf16.mxu0 %v2640_v4 }
 0x2c1   : > { %1318 = vmatpush1.bf16.msra.mxu1 %v2512_v63 }
 0x2c2   : > { %1319 = vmatprep.subr.bf16.mxu1 %v2639_v1 }
 0x2c5   : > { %1320 = vmatpush1.bf16.msra.mxu1 %v2513_v0 }
 0x2c6   : > { %1321 = vmatprep.subr.bf16.mxu1 %v2639_v1 }
 0x2c9   : > { %1322 = vmatpush1.bf16.msra.mxu1 %v2514_v2 }
 0x2ca   : > { %1323 = vmatprep.subr.bf16.mxu1 %v2639_v1 }
 0x2cd   : > { %1324 = vmatpush1.bf16.msra.mxu1 %v2515_v3  ;;  %v2221_v3 = vld [vmem:[%s3282_s16] ss:$0 sm:$0xff] }
 0x2ce   : > { %1325 = vmatprep.subr.bf16.mxu1 %v2639_v1 }
 0x2d1   : > { %1326 = vmatpush1.bf16.msra.mxu1 %v2516_v5 }
 0x2d2   : > { %1327 = vmatprep.subr.bf16.mxu1 %v2639_v1 }
 0x2d5   : > { %1328 = vmatpush1.bf16.msra.mxu1 %v2517_v7 }
 0x2d6   : > { %1331 = vmatprep.subr.bf16.mxu1 %v2639_v1 }
 0x2d9   : > { %1332 = vmatpush2.bf16.msra.mxu1 %v1311_v8 }
 0x2da   : > { %1333 = vmatprep.subr.bf16.mxu1 %v2639_v1 }
 0x2dd   : > { %1334 = vmatpush2.bf16.msra.mxu1 %v2518_v9 }
 0x2de   : > { %1335 = vmatprep.subr.bf16.mxu1 %v2639_v1 }
 0x2e1   : > { %1336 = vmatpush2.bf16.msra.mxu1 %v2519_v10 }
 0x2e2   : > { %1337 = vmatprep.subr.bf16.mxu1 %v2639_v1 }
 0x2e5   : > { %1338 = vmatpush2.bf16.msra.mxu1 %v2520_v11 }
 0x2e6   : > { %1339 = vmatprep.subr.bf16.mxu1 %v2639_v1 }
 0x2e9   : > { %1340 = vmatpush2.bf16.msra.mxu1 %v2521_v12 }
 0x2ea   : > { %1341 = vmatprep.subr.bf16.mxu1 %v2639_v1 }
 0x2ed   : > { %1342 = vmatpush2.bf16.msra.mxu1 %v2522_v13 }
 0x2ee   : > { %1343 = vmatprep.subr.bf16.mxu1 %v2639_v1  ;;  %v2526_v1 = vld [vmem:[%s3277_s11 + $0x8] sm:$0xff]  }
 0x2ef   : > { %2364 = vmatpush3.bf16.msra.mxu0 %v2526_v1 }
 0x2f0   : > { %2365 = vmatprep.subr.bf16.mxu0 %v2640_v4 }
 0x2f1   : > { %1344 = vmatpush2.bf16.msra.mxu1 %v2523_v14 }
 0x2f3   : > { %2366 = vmatpush3.bf16.msra.mxu0 %v2527_v17 }
 0x2f4   : > { %1346 = vmatmul.mubr.bf16.vlgmr.msra.gmra.mxu1 %v2927_v29  ;;  %2371 = vmatprep.subr.bf16.mxu0 %v2640_v4 }
 0x378   : > { %v1215_v18 = vpop.f32.mrf.mxu1 }
 0x37a   : > { %v2357_v19 = vpop.f32.mrf.mxu1 }
 0x37c   : > { %v1218_v20 = vpop.f32.mrf.mxu1 }
 0x37e   : > { %v2358_v21 = vpop.f32.mrf.mxu1 }
 0x3b4   : > { %v1347_v22 = vpop.f32.mrf.mxu1 }
 0x3b5   : > { %v1348_v24 = vadd.f32 %v1347_v22, %v1215_v18 }
 0x3b6   : > { %v1349_v25 = vpop.f32.mrf.mxu1 }
 0x3b7   : > { %v1360_v26 = vadd.f32 %v2205_v23, %v1348_v24 }
 0x3b8   : > { %v1350_v27 = vpop.f32.mrf.mxu1 }
 0x3b9   : > { %v1362_v28 = vmin.f32 %v1360_v26, 0.0  ;;  %vm1361_vm6 = vcmp.gt.f32.partialorder %v1360_v26, 0.0 }
 0x3ba   : > { %v1351_v29 = vpop.f32.mrf.mxu1 }
 0x3bb   : > { %v1363_v30 = vmul.f32 1.442695, %v1362_v28 }
 0x3bd   : > { %2536 = vpow2.f32 %v1363_v30 }
 0x3ca   : > { %v2537_v31 = vpop.eup %2536 }
 0x3cb   : > { %v2206_v32 = vadd.f32 -1.0, %v2537_v31 }
 0x3cd   : > { %v1366_v33 = vsel %vm1361_vm6, %v1360_v26, %v2206_v32 }
 0x3ce   : > { %v1367_v34 = vpack.c.bf16 %v1366_v33, %v1366_v33 }
 0x3d0   : > { %2368 = vmatmul.mubr.msk.bf16.vlgmr.msra.gmra.mxu0 %vm1086_vm4, %v1367_v34 }
 0x3d1   : > { %2379 = vmatprep.mubr.msk.bf16.mxu0 %vm2642_vm3, %v2640_v4  ;;  %2372 = vmatpush3.bf16.msra.mxu0 %v2528_v35 }
 0x3d2   : > { %2373 = vmatprep.subr.bf16.mxu0 %v2640_v4 }
 0x3d5   : > { %2374 = vmatpush3.bf16.msra.mxu0 %v2529_v36 }
 0x3d6   : > { %2375 = vmatprep.subr.bf16.mxu0 %v2640_v4 }
 0x3d9   : > { %2376 = vmatpush3.bf16.msra.mxu0 %v2530_v37 }
 0x3da   : > { %2377 = vmatprep.subr.bf16.mxu0 %v2640_v4 }
 0x3dd   : > { %2378 = vmatpush3.bf16.msra.mxu0 %v2531_v38 }
 0x3de   : > { %2383 = vmatprep.subr.bf16.mxu0 %v2640_v4 }
 0x490   : > { %v1444_v40 = vpop.f32.mrf.mxu0 }
 0x491   : > { %v1445_v41 = vadd.f32 %v2207_v39, %v1444_v40 }
 0x492   : > { %v2369_v42 = vpop.f32.mrf.mxu0 }
 0x493   : > { %v1451_v43 = vmin.f32 %v1445_v41, 0.0  ;;  %vm1450_vm7 = vcmp.gt.f32.partialorder %v1445_v41, 0.0 }
 0x494   : > { %v1447_v44 = vpop.f32.mrf.mxu0 }
 0x495   : > { %v1452_v45 = vmul.f32 1.442695, %v1451_v43 }
 0x496   : > { %v2370_v46 = vpop.f32.mrf.mxu0 }
 0x497   : > { %2538 = vpow2.f32 %v1452_v45 }
 0x4a4   : > { %v2539_v47 = vpop.eup %2538 }
 0x4a5   : > { %v2213_v48 = vadd.f32 -1.0, %v2539_v47 }
 0x4a7   : > { %v1455_v49 = vsel %vm1450_vm7, %v1445_v41, %v2213_v48 }
 0x4a8   : > { %v1456_v50 = vpack.c.bf16 %v1455_v49, %v1455_v49 }
 0x4aa   : > { %2380 = vmatmul.mubr.msk.bf16.vlgmr.msra.gmra.mxu0 %vm1086_vm4, %v1456_v50 }
 0x4ab   : > { %2391 = vmatprep.mubr.msk.bf16.mxu0 %vm2642_vm3, %v2640_v4  ;;  %2384 = vmatpush3.bf16.msra.mxu0 %v2532_v51 }
 0x4ac   : > { %2385 = vmatprep.subr.bf16.mxu0 %v2640_v4 }
 0x4af   : > { %2386 = vmatpush3.bf16.msra.mxu0 %v2533_v52 }
 0x4b0   : > { %2387 = vmatprep.subr.bf16.mxu0 %v2640_v4 }
 0x4b3   : > { %2388 = vmatpush3.bf16.msra.mxu0 %v2534_v53 }
 0x4b4   : > { %2389 = vmatprep.subr.bf16.mxu0 %v2640_v4 }
 0x4b7   : > { %2390 = vmatpush3.bf16.msra.mxu0 %v2535_v54 }
 0x56a   : > { %v1533_v56 = vpop.f32.mrf.mxu0 }
 0x56b   : > { %v1534_v57 = vadd.f32 %v2214_v55, %v1533_v56 }
 0x56c   : > { %v2381_v58 = vpop.f32.mrf.mxu0 }
 0x56d   : > { %v1540_v59 = vmin.f32 %v1534_v57, 0.0  ;;  %vm1539_vm8 = vcmp.gt.f32.partialorder %v1534_v57, 0.0 }
 0x56e   : > { %v1536_v60 = vpop.f32.mrf.mxu0 }
 0x56f   : > { %v1541_v61 = vmul.f32 1.442695, %v1540_v59 }
 0x570   : > { %v2382_v62 = vpop.f32.mrf.mxu0 }
 0x571   : > { %2540 = vpow2.f32 %v1541_v61 }
 0x57e   : > { %v2541_v63 = vpop.eup %2540 }
 0x57f   : > { %v2220_v4 = vadd.f32 -1.0, %v2541_v63 }
 0x581   : > { %v1544_v0 = vsel %vm1539_vm8, %v1534_v57, %v2220_v4 }
 0x582   : > { %v1545_v2 = vpack.c.bf16 %v1544_v0, %v1544_v0 }
 0x584   : > { %2392 = vmatmul.mubr.msk.bf16.vlgmr.msra.gmra.mxu0 %vm1086_vm4, %v1545_v2 }
 0x644   : > { %v1622_v5 = vpop.f32.mrf.mxu0 }
 0x645   : > { %v1623_v6 = vadd.f32 %v2221_v3, %v1622_v5 }
 0x646   : > { %v2393_v7 = vpop.f32.mrf.mxu0 }
 0x647   : > { %1628 = vst [vmem:[%s2829_s0] sm:$0xff] %v1623_v6 }
 0x648   : > { %v1625_v8 = vpop.f32.mrf.mxu0 }
 0x64a   : > { %v2394_v9 = vpop.f32.mrf.mxu0 }
 0x64b PF: > { %p2227_p11 = scmp.ne.s32.totalorder %s2799_s7, 1 }
 0x64c   : > { %s3338_s1 = sld [smem:[#allocation12_spill]] (!%p2227_p11) }
 0x64d   : > { %1632 = sbr.rel (%p2227_p11) target bundleno = 2532 (0x9e4), region = 128 }
 0x652   : > { %v2542_v10 = vld [vmem:[%s3283_s17 + $0x38] sm:$0xff]   ;;  %v2643_v11 = vmov 0   ;;  %v2543_v12 = vld [vmem:[%s3283_s17 + $0x30] sm:$0xff]   ;;  %v2544_v13 = vld [vmem:[%s3283_s17 + $0x28] sm:$0xff]   ;;  %vm1770_vm9 = vcmask 1044480   ;;  %vm1766_vm10 = vcmask 875520  }
 0x653   : > { %1777 = vmatprep.subr.bf16.mxu0 %v2643_v11  ;;  %v2545_v14 = vld [vmem:[%s3283_s17 + $0x20] sm:$0xff]   ;;  %v2546_v15 = vld [vmem:[%s3283_s17 + $0x18] sm:$0xff]   ;;  %v2547_v1 = vld [vmem:[%s3283_s17 + $0x10] sm:$0xff]   ;;  %vm1771_vm11 = vcmask 1045504   ;;  %v2644_v19 = vmov 65535   ;;  %v2645_v33 = vmov 0.0  }
 0x654   : > { %1778 = vmatpush1.bf16.msra.mxu0 %v2542_v10  ;;  %v1633_v16 = vld [vmem:[%s3338_s1] sm:$0xff]  ;;  %v2548_v18 = vld [vmem:[%s3283_s17 + $0x8] sm:$0xff]   ;;  %v1772_v20 = vsel %vm1770_vm9, 4294967295, %v2644_v19  ;;  %v2550_v22 = vld [vmem:[%s3283_s17 + $0x70] sm:$0x3f]   ;;  %2395 = vmatprep.subr.bf16.mxu1 %v2645_v33  ;;  %vm2646_vm12 = vmmov 0  }
 0x655   : > { %1779 = vmatprep.subr.bf16.mxu0 %v2643_v11  ;;  %v2230_v17 = vcombine.high %v1633_v16, %v1633_v16  ;;  %v2549_v21 = vld [vmem:[%s3283_s17] sm:$0xff]   ;;  %v1773_v23 = vsel %vm1771_vm11, %v1772_v20, 0  ;;  %v2551_v25 = vld [vmem:[%s3283_s17 + $0x68] sm:$0xff]   ;;  %v2553_v27 = vld [vmem:[%s3283_s17 + $0x58] sm:$0xff]   ;;  %v2229_v31 = vcombine.low %v1633_v16, %v1633_v16  ;;  %2403 = vmatprep.mubr.msk.bf16.mxu1 %vm2646_vm12, %v2645_v33  ;;  %vm1863_vm14 = vcmask 523264  }
 0x656   : > { %v1775_v24 = vand.u32 %v2550_v22, %v1773_v23  ;;  %v2552_v26 = vld [vmem:[%s3283_s17 + $0x60] sm:$0xff]   ;;  %v2554_v28 = vld [vmem:[%s3283_s17 + $0x50] sm:$0xff]   ;;  %v2555_v29 = vld [vmem:[%s3283_s17 + $0x48] sm:$0xff]  }
 0x657   : > { %2246 = vmatprep.mubr.msk.bf16.mxu0 %vm1766_vm10, %v2230_v17  ;;  %v2556_v30 = vld [vmem:[%s3283_s17 + $0x40] sm:$0xff]   ;;  %v2559_v32 = vld [vmem:[%s3285_s19 + $0x18] sm:$0xff]   ;;  %v2560_v34 = vld [vmem:[%s3285_s19 + $0x10] sm:$0xff]  }
 0x658   : > { %1780 = vmatpush1.bf16.msra.mxu0 %v2543_v12  ;;  %2396 = vmatpush3.bf16.msra.mxu1 %v2559_v32  ;;  %v2561_v35 = vld [vmem:[%s3285_s19 + $0x8] sm:$0xff]   ;;  %v2562_v36 = vld [vmem:[%s3285_s19] sm:$0xff]   ;;  %v2563_v49 = vld [vmem:[%s3287_s21 + $0x18] sm:$0xff]  }
 0x659   : > { %1781 = vmatprep.subr.bf16.mxu0 %v2643_v11  ;;  %2397 = vmatprep.subr.bf16.mxu1 %v2645_v33  ;;  %v2228_v37 = vld [vmem:[%s3284_s18] ss:$0 sm:$0xff]  ;;  %v2564_v50 = vld [vmem:[%s3287_s21 + $0x10] sm:$0xff]   ;;  %v2565_v51 = vld [vmem:[%s3287_s21 + $0x8] sm:$0xff]  }
 0x65a   : > { %v2566_v52 = vld [vmem:[%s3287_s21] sm:$0xff]   ;;  %v2567_v0 = vld [vmem:[%s3289_s23 + $0x18] sm:$0xff]   ;;  %v2568_v2 = vld [vmem:[%s3289_s23 + $0x10] sm:$0xff]  }
 0x65b   : > { %v2248_v53 = vld [vmem:[%s3286_s20] ss:$0 sm:$0xff]  ;;  %v2569_v3 = vld [vmem:[%s3289_s23 + $0x8] sm:$0xff]  }
 0x65c   : > { %1782 = vmatpush1.bf16.msra.mxu0 %v2544_v13  ;;  %2398 = vmatpush3.bf16.msra.mxu1 %v2560_v34  ;;  %v2570_v5 = vld [vmem:[%s3289_s23] sm:$0xff]  }
 0x65d   : > { %1783 = vmatprep.subr.bf16.mxu0 %v2643_v11  ;;  %2399 = vmatprep.subr.bf16.mxu1 %v2645_v33  ;;  %v2255_v6 = vld [vmem:[%s3288_s22] ss:$0 sm:$0xff] }
 0x65e   : > { %v2262_v17 = vld [vmem:[%s3290_s24] ss:$0 sm:$0xff] }
 0x660   : > { %1784 = vmatpush1.bf16.msra.mxu0 %v2545_v14  ;;  %2400 = vmatpush3.bf16.msra.mxu1 %v2561_v35 }
 0x661   : > { %1785 = vmatprep.subr.bf16.mxu0 %v2643_v11  ;;  %2401 = vmatprep.subr.bf16.mxu1 %v2645_v33 }
 0x664   : > { %1786 = vmatpush1.bf16.msra.mxu0 %v2546_v15  ;;  %2402 = vmatpush3.bf16.msra.mxu1 %v2562_v36 }
 0x665   : > { %1787 = vmatprep.subr.bf16.mxu0 %v2643_v11  ;;  %2407 = vmatprep.subr.bf16.mxu1 %v2645_v33 }
 0x668   : > { %1788 = vmatpush1.bf16.msra.mxu0 %v2547_v1 }
 0x669   : > { %1789 = vmatprep.subr.bf16.mxu0 %v2643_v11 }
 0x66c   : > { %1790 = vmatpush1.bf16.msra.mxu0 %v2548_v18 }
 0x66d   : > { %1791 = vmatprep.subr.bf16.mxu0 %v2643_v11 }
 0x670   : > { %1792 = vmatpush1.bf16.msra.mxu0 %v2549_v21 }
 0x671   : > { %1795 = vmatprep.subr.bf16.mxu0 %v2643_v11 }
 0x674   : > { %1796 = vmatpush2.bf16.msra.mxu0 %v1775_v24 }
 0x675   : > { %1797 = vmatprep.subr.bf16.mxu0 %v2643_v11 }
 0x678   : > { %1798 = vmatpush2.bf16.msra.mxu0 %v2551_v25 }
 0x679   : > { %1799 = vmatprep.subr.bf16.mxu0 %v2643_v11 }
 0x67c   : > { %1800 = vmatpush2.bf16.msra.mxu0 %v2552_v26 }
 0x67d   : > { %1801 = vmatprep.subr.bf16.mxu0 %v2643_v11 }
 0x680   : > { %1802 = vmatpush2.bf16.msra.mxu0 %v2553_v27 }
 0x681   : > { %1803 = vmatprep.subr.bf16.mxu0 %v2643_v11 }
 0x684   : > { %1804 = vmatpush2.bf16.msra.mxu0 %v2554_v28 }
 0x685   : > { %1805 = vmatprep.subr.bf16.mxu0 %v2643_v11 }
 0x688   : > { %1806 = vmatpush2.bf16.msra.mxu0 %v2555_v29 }
 0x689   : > { %1807 = vmatprep.subr.bf16.mxu0 %v2643_v11 }
 0x68c   : > { %1808 = vmatpush2.bf16.msra.mxu0 %v2556_v30 }
 0x68f   : > { %1810 = vmatmul.mubr.bf16.vlgmr.msra.gmra.mxu0 %v2229_v31 }
 0x74f   : > { %v1811_v38 = vpop.f32.mrf.mxu0 }
 0x750   : > { %v1812_v39 = vadd.f32 %v2228_v37, %v1811_v38 }
 0x751   : > { %v1813_v40 = vpop.f32.mrf.mxu0 }
 0x752   : > { %v1818_v41 = vmin.f32 %v1812_v39, 0.0  ;;  %vm1817_vm13 = vcmp.gt.f32.partialorder %v1812_v39, 0.0 }
 0x753   : > { %v1814_v42 = vpop.f32.mrf.mxu0 }
 0x754   : > { %v1819_v43 = vmul.f32 1.442695, %v1818_v41 }
 0x755   : > { %v1815_v44 = vpop.f32.mrf.mxu0 }
 0x756   : > { %2571 = vpow2.f32 %v1819_v43 }
 0x763   : > { %v2572_v45 = vpop.eup %2571 }
 0x764   : > { %v2247_v46 = vadd.f32 -1.0, %v2572_v45 }
 0x766   : > { %v1822_v47 = vsel %vm1817_vm13, %v1812_v39, %v2247_v46 }
 0x767   : > { %v1823_v48 = vpack.c.bf16 %v1822_v47, %v1822_v47 }
 0x769   : > { %2404 = vmatmul.mubr.msk.bf16.vlgmr.msra.gmra.mxu1 %vm1863_vm14, %v1823_v48 }
 0x76a   : > { %2415 = vmatprep.mubr.msk.bf16.mxu1 %vm2646_vm12, %v2645_v33  ;;  %2408 = vmatpush3.bf16.msra.mxu1 %v2563_v49 }
 0x76b   : > { %2409 = vmatprep.subr.bf16.mxu1 %v2645_v33 }
 0x76e   : > { %2410 = vmatpush3.bf16.msra.mxu1 %v2564_v50 }
 0x76f   : > { %2411 = vmatprep.subr.bf16.mxu1 %v2645_v33 }
 0x772   : > { %2412 = vmatpush3.bf16.msra.mxu1 %v2565_v51 }
 0x773   : > { %2413 = vmatprep.subr.bf16.mxu1 %v2645_v33 }
 0x776   : > { %2414 = vmatpush3.bf16.msra.mxu1 %v2566_v52 }
 0x777   : > { %2419 = vmatprep.subr.bf16.mxu1 %v2645_v33 }
 0x829   : > { %v1901_v54 = vpop.f32.mrf.mxu1 }
 0x82a   : > { %v1902_v55 = vadd.f32 %v2248_v53, %v1901_v54 }
 0x82b   : > { %v2405_v56 = vpop.f32.mrf.mxu1 }
 0x82c   : > { %v1908_v57 = vmin.f32 %v1902_v55, 0.0  ;;  %vm1907_vm15 = vcmp.gt.f32.partialorder %v1902_v55, 0.0 }
 0x82d   : > { %v1904_v58 = vpop.f32.mrf.mxu1 }
 0x82e   : > { %v1909_v59 = vmul.f32 1.442695, %v1908_v57 }
 0x82f   : > { %v2406_v60 = vpop.f32.mrf.mxu1 }
 0x830   : > { %2573 = vpow2.f32 %v1909_v59 }
 0x83d   : > { %v2574_v61 = vpop.eup %2573 }
 0x83e   : > { %v2254_v62 = vadd.f32 -1.0, %v2574_v61 }
 0x840   : > { %v1912_v63 = vsel %vm1907_vm15, %v1902_v55, %v2254_v62 }
 0x841   : > { %v1913_v4 = vpack.c.bf16 %v1912_v63, %v1912_v63 }
 0x843   : > { %2416 = vmatmul.mubr.msk.bf16.vlgmr.msra.gmra.mxu1 %vm1863_vm14, %v1913_v4 }
 0x844   : > { %2427 = vmatprep.mubr.msk.bf16.mxu1 %vm2646_vm12, %v2645_v33  ;;  %2420 = vmatpush3.bf16.msra.mxu1 %v2567_v0 }
 0x845   : > { %2421 = vmatprep.subr.bf16.mxu1 %v2645_v33 }
 0x848   : > { %2422 = vmatpush3.bf16.msra.mxu1 %v2568_v2 }
 0x849   : > { %2423 = vmatprep.subr.bf16.mxu1 %v2645_v33 }
 0x84c   : > { %2424 = vmatpush3.bf16.msra.mxu1 %v2569_v3 }
 0x84d   : > { %2425 = vmatprep.subr.bf16.mxu1 %v2645_v33 }
 0x850   : > { %2426 = vmatpush3.bf16.msra.mxu1 %v2570_v5 }
 0x903   : > { %v1990_v7 = vpop.f32.mrf.mxu1 }
 0x904   : > { %v1991_v8 = vadd.f32 %v2255_v6, %v1990_v7 }
 0x905   : > { %v2417_v9 = vpop.f32.mrf.mxu1 }
 0x906   : > { %v1997_v10 = vmin.f32 %v1991_v8, 0.0  ;;  %vm1996_vm0 = vcmp.gt.f32.partialorder %v1991_v8, 0.0 }
 0x907   : > { %v1993_v11 = vpop.f32.mrf.mxu1 }
 0x908   : > { %v1998_v12 = vmul.f32 1.442695, %v1997_v10 }
 0x909   : > { %v2418_v13 = vpop.f32.mrf.mxu1 }
 0x90a   : > { %2575 = vpow2.f32 %v1998_v12 }
 0x917   : > { %v2576_v14 = vpop.eup %2575 }
 0x918   : > { %v2261_v15 = vadd.f32 -1.0, %v2576_v14 }
 0x91a   : > { %v2001_v16 = vsel %vm1996_vm0, %v1991_v8, %v2261_v15 }
 0x91b   : > { %v2002_v1 = vpack.c.bf16 %v2001_v16, %v2001_v16 }
 0x91d   : > { %2428 = vmatmul.mubr.msk.bf16.vlgmr.msra.gmra.mxu1 %vm1863_vm14, %v2002_v1 }
 0x9dd   : > { %v2079_v18 = vpop.f32.mrf.mxu1 }
 0x9de   : > { %v2080_v19 = vadd.f32 %v2262_v17, %v2079_v18 }
 0x9df   : > { %v2429_v20 = vpop.f32.mrf.mxu1 }
 0x9e0   : > { %2085 = vst [vmem:[%s2829_s0] sm:$0xff] %v2080_v19 }
 0x9e1   : > { %v2082_v21 = vpop.f32.mrf.mxu1 }
 0x9e3   : > { %v2430_v22 = vpop.f32.mrf.mxu1 }
 0x9e4 PF: > { %s2269_s30 = sshll.u32 %s2799_s7, 7  ;;  %s2100_s8 = sshll.u32 %s2829_s0, 4  ;;  %s2101_s8 = int_to_ptr.vmem [resolvable:$true] %s2100_s8 }
 0x9e5   : > { %s2098_s26 = scalar_lea.hbm %s3291_s25, %s2269_s30  ;;  %s3339_s6 = sand.u32 1, %s2629_s2  }
 0x9e6   : > { %s2087_s1 = scalar_lea.sflag [#allocation3], %s3339_s6  ;;  %s2577_s27 = scalar_lea.vmem %s2101_s8, 128 }
 0x9e7   : > { %p2578_p12 = scmp.ne.s32.totalorder %s2101_s8, %s2577_s27  ;;  %s2647_s29 = smov [#allocation2]  }
 0x9e8   : > { %s2581_s9 = sshll.u32 %s2647_s29, 4  ;;  %s2582_s9 = int_to_ptr.vmem [resolvable:$false] %s2581_s9 }
 0x9e9   : > { %p2579_p13 = pnand %p2578_p12, %p2816_p5  ;;  %s2583_s10 = scalar_lea.vmem %s2582_s9, 256 }
 0x9ea   : > { %p2584_p1 = scmp.lt.s32.totalorder %s2101_s8, %s2582_s9  ;;  %p2585_p2 = scmp.lt.s32.totalorder %s2583_s10, %s2577_s27 }
 0x9eb   : > { %p2580_p0 = pneg %p2579_p13 }
 0x9ec   : > { %p2586_p3 = por %p2585_p2, %p2584_p1 }
 0x9ee   : > { %p2587_p4 = pnand %p2586_p3, %p2580_p0 }
 0x9f0   : > { %2590 = shalt.err (!%p2587_p4)
}
 0x9f1   : > { %s2591_s7 = scalar_lea.hbm %s2098_s26, 128  ;;  %s2595_s5 = scalar_lea.hbm %s3291_s25, 256 }
 0x9f2   : > { %p2592_p7 = scmp.ne.s32.totalorder %s2098_s26, %s2591_s7  ;;  %p2596_p10 = scmp.lt.s32.totalorder %s2098_s26, %s3291_s25 }
 0x9f3   : > { %p2597_p11 = scmp.lt.s32.totalorder %s2595_s5, %s2591_s7 }
 0x9f4   : > { %p2593_p8 = pnand %p2592_p7, %p2816_p5 }
 0x9f5   : > { %p2598_p12 = por %p2597_p11, %p2596_p10 }
 0x9f6   : > { %p2594_p9 = pneg %p2593_p8 }
 0x9f8   : > { %p2599_p13 = pnand %p2598_p12, %p2594_p9 }
 0x9fa   : > { %2602 = shalt.err (!%p2599_p13)
}
 0x9fb   : > { %2431 = dma.vmem_to_hbm [thread:$0]  (%p2816_p5), %s2101_s8, 128, %s2098_s26, %s2087_s1  }
 0x9fc PF: > { %s3340_s10 = sld [smem:[#allocation7_spill]] }
 0x9fd   : > { %s3341_s9 = sld [smem:[#allocation5_spill]] }
 0xa02   : > { %p2437_p0 = scmp.ge.s32.totalorder %s3340_s10, 2 }
 0xa03   : > { %s2112_s29 = sand.u32 1, %s3341_s9  }
 0xa04   : > { %p2434_p1 = pnand %p2437_p0, %p2820_p6  ;;  %s2113_s0 = scalar_lea.sflag [#allocation3], %s2112_s29 }
 0xa06   : > { %p2435_p2 = pneg %p2434_p1 }
 0xa08   : > { %2620 = dma.done.wait (%p2435_p2), %s2113_s0, 128  }
 0xa09   : > { %2622 = vsyncadd (%p2435_p2), %s2113_s0, 4294967168  ;;  %s3343_s30 = sld [smem:[#allocation8_spill]]  ;;  %s3346_s29 = smov %s2629_s2 }
 0xa0a   : > { %s3344_s7 = sld [smem:[#allocation6_spill]] }
 0xa0b   : > { %s3345_s6 = sld [smem:[#allocation9_spill]] }
 0xa0f   : > { %p35_p3 = scmp.ge.s32.totalorder %s3343_s30, 4  }
 0xa10   : > { %s3347_s2 = smov %s3344_s7 }
 0xa11   :  { %37 = sbr.rel (!%p35_p3) target bundleno = 15 (0xf), region = 160 }
 0xa16   :  { %2118 = vsyncpa [#allocation3], 1 }
 0xa17   :  { %2120 = vsyncpa [#allocation3 + $0x1], 1 }

</bundles_post_ra>
